<compile_context>
chip_gen: v6e
topology: v6e:2x2x1
jax: 0.10.0
libtpu: 0.0.40
codegen_flags: <defaults>
</compile_context>

<pallas_src>
import functools
import math

import jax
import jax.numpy as jnp
from jax.experimental import pallas as pl
from jax.experimental.pallas import tpu as pltpu

# ----------------------------- model config (small synthetic BART) ----------
D_MODEL = 128         # (bart-large: 1024)
N_HEADS = 4           # (bart-large: 16)
HEAD_DIM = D_MODEL // N_HEADS     # 32 (bart-large: 64)
FFN_DIM = 256         # (bart-large: 4096)
N_LAYERS = 2          # (bart-large: 12 enc / 12 dec)
VOCAB = 256           # (bart-large: 50265 -> padded internally to a tile multiple)
MAX_POS = 64
POS_OFFSET = 2        # BART learned-position offset
PAD_ID = 1
EPS = 1e-5
NEG_INF = -1e9        # additive mask value (stands in for float('-inf'))

ROW_TARGET = 256      # rows per tile
LANE_TARGET = 512     # lanes per tile (multiple of 128); 1024 is better on v6e
FFN_CHUNK = 512       # FFN_DIM tile (reduction axis of the fused FFN kernel)
Q_TILE = 256          # query rows per attention grid step
VMEM_LIMIT = 64 * 1024 * 1024


def _round_up(x, m):
    return (x + m - 1) // m * m


def _block_and_pad(dim, target, quantum):
    """Block size <= target (multiple of quantum) and dim padded to a multiple."""
    if dim <= target:
        block = _round_up(dim, quantum)
    else:
        block = (target // quantum) * quantum
    return block, _round_up(dim, block)


def _pad_to(a, shape):
    pads = [(0, t - s) for s, t in zip(a.shape, shape)]
    if all(p == (0, 0) for p in pads):
        return a
    return jnp.pad(a, pads)


def _gelu(x):
    # exact (erf) gelu, matching torch F.gelu default
    return 0.5 * x * (1.0 + jax.lax.erf(x * (1.0 / math.sqrt(2.0))))


def _bf16(x):
    return x.astype(jnp.bfloat16)


# ----------------------------- generic tiled matmul -------------------------


def _matmul_kernel(x_ref, w_ref, b_ref, o_ref, acc_ref):
    @pl.when(pl.program_id(2) == 0)
    def _():
        acc_ref[...] = jnp.zeros_like(acc_ref)

    acc_ref[...] += jnp.dot(_bf16(x_ref[...]), w_ref[...],
                            preferred_element_type=jnp.float32)

    @pl.when(pl.program_id(2) == pl.num_programs(2) - 1)
    def _():
        o_ref[...] = (acc_ref[...] + b_ref[...]).astype(o_ref.dtype)


def matmul(x, w, b=None, *, out_dtype=jnp.float32):
    """x:(M,K) @ w:(K,N) [+ b:(1,N)] -> (M,N). M/N/K tiled, f32 accumulation.
    All axes are padded to tileable sizes (vocab-safe) and the result sliced."""
    M, K = x.shape
    N = w.shape[1]
    if b is None:
        b = jnp.zeros((1, N), jnp.float32)
    tm, Mp = _block_and_pad(M, ROW_TARGET, 8)
    tn, Np = _block_and_pad(N, LANE_TARGET, 128)
    tk, Kp = _block_and_pad(K, LANE_TARGET, 128)
    xp = _pad_to(x, (Mp, Kp))
    wp = _pad_to(w, (Kp, Np))
    bp = _pad_to(b, (1, Np))
    out = pl.pallas_call(
        _matmul_kernel,
        out_shape=jax.ShapeDtypeStruct((Mp, Np), out_dtype),
        grid=(Mp // tm, Np // tn, Kp // tk),
        in_specs=[
            pl.BlockSpec((tm, tk), lambda i, j, k: (i, k)),
            pl.BlockSpec((tk, tn), lambda i, j, k: (k, j)),
            pl.BlockSpec((1, tn), lambda i, j, k: (0, j)),
        ],
        out_specs=pl.BlockSpec((tm, tn), lambda i, j, k: (i, j)),
        scratch_shapes=[pltpu.VMEM((tm, tn), jnp.float32)],
        compiler_params=pltpu.CompilerParams(
            dimension_semantics=("parallel", "parallel", "arbitrary"),
            vmem_limit_bytes=VMEM_LIMIT),
    )(xp, wp, bp)
    if (Mp, Np) != (M, N):
        out = out[:M, :N]
    return out


# ----------------------------- layernorm (embeddings) -----------------------


def _layernorm_kernel(x_ref, g_ref, b_ref, o_ref, *, eps):
    x = x_ref[...].astype(jnp.float32)
    mu = jnp.mean(x, axis=-1, keepdims=True)
    var = jnp.mean((x - mu) ** 2, axis=-1, keepdims=True)
    o_ref[...] = (x - mu) * jax.lax.rsqrt(var + eps) * g_ref[...] + b_ref[...]


def layernorm(x, g, b):
    M, D = x.shape
    tm, Mp = _block_and_pad(M, ROW_TARGET, 8)
    xp = _pad_to(x, (Mp, D))
    out = pl.pallas_call(
        functools.partial(_layernorm_kernel, eps=EPS),
        out_shape=jax.ShapeDtypeStruct((Mp, D), jnp.float32),
        grid=(Mp // tm,),
        in_specs=[
            pl.BlockSpec((tm, D), lambda i: (i, 0)),
            pl.BlockSpec((1, D), lambda i: (0, 0)),
            pl.BlockSpec((1, D), lambda i: (0, 0)),
        ],
        out_specs=pl.BlockSpec((tm, D), lambda i: (i, 0)),
        compiler_params=pltpu.CompilerParams(
            dimension_semantics=("parallel",), vmem_limit_bytes=VMEM_LIMIT),
    )(xp, g, b)
    return out[:M] if Mp != M else out


# ----------------------------- projection + residual + LN -------------------


def _proj_res_ln_kernel(x_ref, w_ref, b_ref, r_ref, g_ref, beta_ref, o_ref, *, eps):
    y = jnp.dot(_bf16(x_ref[...]), w_ref[...],
                preferred_element_type=jnp.float32) + b_ref[...]
    y = y + r_ref[...]                      # fused residual add
    mu = jnp.mean(y, axis=-1, keepdims=True)
    var = jnp.mean((y - mu) ** 2, axis=-1, keepdims=True)
    o_ref[...] = (y - mu) * jax.lax.rsqrt(var + eps) * g_ref[...] + beta_ref[...]


def proj_res_ln(x, w, b, res, g, beta):
    M, K = x.shape
    N = w.shape[1]
    tm, Mp = _block_and_pad(M, ROW_TARGET, 8)
    xp = _pad_to(x, (Mp, K))
    rp = _pad_to(res, (Mp, N))
    # NOTE: pl.Buffered(1) on the constant-index weight specs would halve their
    # VMEM footprint; default double-buffering kept here for portability.
    out = pl.pallas_call(
        functools.partial(_proj_res_ln_kernel, eps=EPS),
        out_shape=jax.ShapeDtypeStruct((Mp, N), jnp.float32),
        grid=(Mp // tm,),
        in_specs=[
            pl.BlockSpec((tm, K), lambda i: (i, 0)),
            pl.BlockSpec((K, N), lambda i: (0, 0)),
            pl.BlockSpec((1, N), lambda i: (0, 0)),
            pl.BlockSpec((tm, N), lambda i: (i, 0)),
            pl.BlockSpec((1, N), lambda i: (0, 0)),
            pl.BlockSpec((1, N), lambda i: (0, 0)),
        ],
        out_specs=pl.BlockSpec((tm, N), lambda i: (i, 0)),
        compiler_params=pltpu.CompilerParams(
            dimension_semantics=("parallel",), vmem_limit_bytes=VMEM_LIMIT),
    )(xp, w, b, rp, g, beta)
    return out[:M] if Mp != M else out


# ----------------------------- fused FFN (fc1+gelu+fc2+res+LN), F-tiled ------


def _ffn_res_ln_kernel(x_ref, w1_ref, b1_ref, w2_ref, b2_ref, g_ref, beta_ref,
                       o_ref, acc_ref, *, eps):
    @pl.when(pl.program_id(1) == 0)
    def _():
        acc_ref[...] = jnp.zeros_like(acc_ref)

    x = x_ref[...]
    h = jnp.dot(_bf16(x), w1_ref[...],
                preferred_element_type=jnp.float32) + b1_ref[...]
    h = _gelu(h)
    acc_ref[...] += jnp.dot(_bf16(h), w2_ref[...],
                            preferred_element_type=jnp.float32)

    @pl.when(pl.program_id(1) == pl.num_programs(1) - 1)
    def _():
        y = acc_ref[...] + b2_ref[...] + x          # residual = FFN input
        mu = jnp.mean(y, axis=-1, keepdims=True)
        var = jnp.mean((y - mu) ** 2, axis=-1, keepdims=True)
        o_ref[...] = (y - mu) * jax.lax.rsqrt(var + eps) * g_ref[...] + beta_ref[...]


def ffn_res_ln(x, w1, b1, w2, b2, g, beta):
    """Tiles the FFN_DIM axis on the grid so only (D, tf)+(tf, D) weight chunks
    are resident per step (bounded VMEM at bart-large scale)."""
    M, D = x.shape
    F = w1.shape[1]
    tm, Mp = _block_and_pad(M, ROW_TARGET, 8)
    tf, Fp = _block_and_pad(F, FFN_CHUNK, 128)
    xp = _pad_to(x, (Mp, D))
    w1p = _pad_to(w1, (D, Fp))
    b1p = _pad_to(b1, (1, Fp))
    w2p = _pad_to(w2, (Fp, D))
    out = pl.pallas_call(
        functools.partial(_ffn_res_ln_kernel, eps=EPS),
        out_shape=jax.ShapeDtypeStruct((Mp, D), jnp.float32),
        grid=(Mp // tm, Fp // tf),
        in_specs=[
            pl.BlockSpec((tm, D), lambda i, j: (i, 0)),
            pl.BlockSpec((D, tf), lambda i, j: (0, j)),
            pl.BlockSpec((1, tf), lambda i, j: (0, j)),
            pl.BlockSpec((tf, D), lambda i, j: (j, 0)),
            pl.BlockSpec((1, D), lambda i, j: (0, 0)),
            pl.BlockSpec((1, D), lambda i, j: (0, 0)),
            pl.BlockSpec((1, D), lambda i, j: (0, 0)),
        ],
        out_specs=pl.BlockSpec((tm, D), lambda i, j: (i, 0)),
        scratch_shapes=[pltpu.VMEM((tm, D), jnp.float32)],
        compiler_params=pltpu.CompilerParams(
            dimension_semantics=("parallel", "arbitrary"),
            vmem_limit_bytes=VMEM_LIMIT),
    )(xp, w1p, b1p, w2p, b2, g, beta)
    return out[:M] if Mp != M else out


# ----------------------------- attention (head-batched, q-tiled) ------------


def _mha_kernel(q_ref, k_ref, v_ref, pad_ref, o_ref, *, scale, causal, q_tile):
    q = q_ref[0]                                  # (H, tq, hd) bf16
    k = k_ref[0]                                  # (H, Sk, hd) bf16
    v = v_ref[0]
    # head-batched score matmul (single dot_general, leading head batch dim)
    s = jnp.einsum("hqd,hkd->hqk", q, k,
                   preferred_element_type=jnp.float32) * scale
    s = s + pad_ref[0]                            # (1, Sk) additive key-pad row
    if causal:
        tq, sk = s.shape[-2], s.shape[-1]
        q0 = pl.program_id(1) * q_tile
        r = q0 + jax.lax.broadcasted_iota(jnp.int32, (tq, sk), 0)
        c = jax.lax.broadcasted_iota(jnp.int32, (tq, sk), 1)
        s = jnp.where((c > r)[None], NEG_INF, s)  # mask built lazily per tile
    s = s - jnp.max(s, axis=-1, keepdims=True)
    p = jnp.exp(s)
    p = p * pl.reciprocal(jnp.sum(p, axis=-1, keepdims=True), approx=True)
    ctx = jnp.einsum("hqk,hkd->hqd", _bf16(p), v,
                     preferred_element_type=jnp.float32)
    o_ref[0] = ctx.astype(o_ref.dtype)


def attention(q, k, v, pad_add, *, causal):
    """q:(B,H,Sq,hd), k/v:(B,H,Sk,hd) bf16, pad_add:(B,1,Sk) additive f32.
    Grid = (batch, query tile): megacore parallelism + bounded per-step VMEM."""
    B, H, Sq, hd = q.shape
    Sk = k.shape[2]
    tq, Sqp = _block_and_pad(Sq, Q_TILE, 8)
    qp = _pad_to(q, (B, H, Sqp, hd))
    out = pl.pallas_call(
        functools.partial(_mha_kernel, scale=HEAD_DIM ** -0.5, causal=causal,
                          q_tile=tq),
        out_shape=jax.ShapeDtypeStruct((B, H, Sqp, hd), jnp.bfloat16),
        grid=(B, Sqp // tq),
        in_specs=[
            pl.BlockSpec((1, H, tq, hd), lambda b, qi: (b, 0, qi, 0)),
            pl.BlockSpec((1, H, Sk, hd), lambda b, qi: (b, 0, 0, 0)),
            pl.BlockSpec((1, H, Sk, hd), lambda b, qi: (b, 0, 0, 0)),
            pl.BlockSpec((1, 1, Sk), lambda b, qi: (b, 0, 0)),
        ],
        out_specs=pl.BlockSpec((1, H, tq, hd), lambda b, qi: (b, 0, qi, 0)),
        compiler_params=pltpu.CompilerParams(
            dimension_semantics=("parallel", "parallel"),
            vmem_limit_bytes=VMEM_LIMIT),
    )(qp, k, v, pad_add)
    return out[:, :, :Sq] if Sqp != Sq else out


def _split_heads(x2d, B, S):
    # (B*S, D) -> (B, H, S, hd); plain XLA relayout (cheap at these sizes)
    return _bf16(x2d).reshape(B, S, N_HEADS, HEAD_DIM).transpose(0, 2, 1, 3)


def _merge_heads(ctx, B, S):
    # (B, H, S, hd) -> (B*S, D)
    return ctx.transpose(0, 2, 1, 3).reshape(B * S, D_MODEL)


# ----------------------------- model pieces (wrappers) ----------------------


def encoder_layer(p, x2d, B, S, pad_add):
    # post-LN (normalize_before=False); dropout is identity in eval
    D = D_MODEL
    qkv = matmul(x2d, p["self_qkv"]["w"], p["self_qkv"]["b"],
                 out_dtype=jnp.bfloat16)                       # fused QKV, bf16
    q = _split_heads(qkv[:, :D], B, S)
    k = _split_heads(qkv[:, D:2 * D], B, S)
    v = _split_heads(qkv[:, 2 * D:], B, S)
    ctx = _merge_heads(attention(q, k, v, pad_add, causal=False), B, S)
    x2d = proj_res_ln(ctx, p["self_out"]["w"], p["self_out"]["b"], x2d,
                      p["self_attn_ln"]["g"], p["self_attn_ln"]["b"])
    x2d = ffn_res_ln(x2d, p["fc1"]["w"], p["fc1"]["b"],
                     p["fc2"]["w"], p["fc2"]["b"],
                     p["final_ln"]["g"], p["final_ln"]["b"])
    return x2d


def decoder_layer(p, y2d, enc2d, B, S_tgt, S_src, dec_pad, enc_pad):
    D = D_MODEL
    # masked self-attention
    qkv = matmul(y2d, p["self_qkv"]["w"], p["self_qkv"]["b"],
                 out_dtype=jnp.bfloat16)
    q = _split_heads(qkv[:, :D], B, S_tgt)
    k = _split_heads(qkv[:, D:2 * D], B, S_tgt)
    v = _split_heads(qkv[:, 2 * D:], B, S_tgt)
    ctx = _merge_heads(attention(q, k, v, dec_pad, causal=True), B, S_tgt)
    y2d = proj_res_ln(ctx, p["self_out"]["w"], p["self_out"]["b"], y2d,
                      p["self_attn_ln"]["g"], p["self_attn_ln"]["b"])
    # cross-attention (fused K/V projection of the encoder states)
    q = _split_heads(matmul(y2d, p["cross_q"]["w"], p["cross_q"]["b"],
                            out_dtype=jnp.bfloat16), B, S_tgt)
    kv = matmul(enc2d, p["cross_kv"]["w"], p["cross_kv"]["b"],
                out_dtype=jnp.bfloat16)
    k = _split_heads(kv[:, :D], B, S_src)
    v = _split_heads(kv[:, D:], B, S_src)
    ctx = _merge_heads(attention(q, k, v, enc_pad, causal=False), B, S_tgt)
    y2d = proj_res_ln(ctx, p["cross_out"]["w"], p["cross_out"]["b"], y2d,
                      p["encoder_attn_ln"]["g"], p["encoder_attn_ln"]["b"])
    # FFN
    y2d = ffn_res_ln(y2d, p["fc1"]["w"], p["fc1"]["b"],
                     p["fc2"]["w"], p["fc2"]["b"],
                     p["final_ln"]["g"], p["final_ln"]["b"])
    return y2d


def shift_tokens_right(input_ids, pad_id):
    # old transformers modeling_bart.shift_tokens_right semantics
    B = input_ids.shape[0]
    eos_idx = jnp.sum(input_ids != pad_id, axis=1) - 1
    first = input_ids[jnp.arange(B), eos_idx]
    return jnp.concatenate([first[:, None], input_ids[:, :-1]], axis=1)


def bart_lm_forward(params, input_ids, output_ids, input_mask, output_mask):
    # NOTE: output_mask is accepted but unused, exactly like the PyTorch forward.
    del output_mask
    B, S_src = input_ids.shape

    # additive key-pad rows (full masks are built lazily inside the kernels)
    enc_pad = jnp.where(input_mask == 0, NEG_INF, 0.0).astype(jnp.float32)[:, None, :]

    # ---------------- encoder ----------------
    x = params["embed_tokens"][input_ids]        # embed_scale = 1.0 for bart-large
    x = x + params["enc_embed_pos"][jnp.arange(S_src) + POS_OFFSET][None]
    x2d = layernorm(x.reshape(B * S_src, D_MODEL),
                    params["enc_ln_emb"]["g"], params["enc_ln_emb"]["b"])
    for lp in params["enc_layers"]:
        x2d = encoder_layer(lp, x2d, B, S_src, enc_pad)
    enc2d = x2d                                                  # (B*Ssrc, D)

    # ------- _prepare_bart_decoder_inputs -------
    dec_input_ids = shift_tokens_right(output_ids, PAD_ID)
    S_tgt = dec_input_ids.shape[1]
    dec_pad = jnp.where(dec_input_ids == PAD_ID, NEG_INF, 0.0).astype(jnp.float32)[:, None, :]

    # ---------------- decoder ----------------
    y = params["embed_tokens"][dec_input_ids]
    y = y + params["dec_embed_pos"][jnp.arange(S_tgt) + POS_OFFSET][None]
    y2d = layernorm(y.reshape(B * S_tgt, D_MODEL),
                    params["dec_ln_emb"]["g"], params["dec_ln_emb"]["b"])
    for lp in params["dec_layers"]:
        y2d = decoder_layer(lp, y2d, enc2d, B, S_tgt, S_src, dec_pad, enc_pad)

    # ---------------- LM head (nn.Linear, bias=False) ----------------
    logits = matmul(y2d, params["lm_head_w"], None, out_dtype=jnp.float32)
    return logits.reshape(B, S_tgt, VOCAB)


# ----------------------------- parameter init --------------------------------


def init_params(key):
    keys = iter(jax.random.split(key, 512))

    def nk():
        return next(keys)

    def lin(din, dout):
        # weights live in HBM as bf16 (halves DMA on the mem-bound matmuls)
        w = (jax.random.normal(nk(), (din, dout), jnp.float32) * 0.02)
        return {"w": w.astype(jnp.bfloat16),
                "b": jnp.zeros((1, dout), jnp.float32)}

    def lnp():
        return {"g": jnp.ones((1, D_MODEL), jnp.float32),
                "b": jnp.zeros((1, D_MODEL), jnp.float32)}

    def enc_layer_p():
        return {"self_qkv": lin(D_MODEL, 3 * D_MODEL),
                "self_out": lin(D_MODEL, D_MODEL),
                "self_attn_ln": lnp(),
                "fc1": lin(D_MODEL, FFN_DIM), "fc2": lin(FFN_DIM, D_MODEL),
                "final_ln": lnp()}

    def dec_layer_p():
        return {"self_qkv": lin(D_MODEL, 3 * D_MODEL),
                "self_out": lin(D_MODEL, D_MODEL),
                "self_attn_ln": lnp(),
                "cross_q": lin(D_MODEL, D_MODEL),
                "cross_kv": lin(D_MODEL, 2 * D_MODEL),
                "cross_out": lin(D_MODEL, D_MODEL),
                "encoder_attn_ln": lnp(),
                "fc1": lin(D_MODEL, FFN_DIM), "fc2": lin(FFN_DIM, D_MODEL),
                "final_ln": lnp()}

    return {
        "embed_tokens": jax.random.normal(nk(), (VOCAB, D_MODEL), jnp.float32) * 0.02,
        "enc_embed_pos": jax.random.normal(nk(), (MAX_POS + POS_OFFSET, D_MODEL), jnp.float32) * 0.02,
        "dec_embed_pos": jax.random.normal(nk(), (MAX_POS + POS_OFFSET, D_MODEL), jnp.float32) * 0.02,
        "enc_ln_emb": lnp(),
        "dec_ln_emb": lnp(),
        "enc_layers": [enc_layer_p() for _ in range(N_LAYERS)],
        "dec_layers": [dec_layer_p() for _ in range(N_LAYERS)],
        "lm_head_w": (jax.random.normal(nk(), (D_MODEL, VOCAB), jnp.float32) * 0.02
                      ).astype(jnp.bfloat16),
    }


# ----------------------------- main ------------------------------------------

if __name__ == "__main__":
    B, S = 2, 8
    root = jax.random.PRNGKey(0)
    k_par, k_in, k_out = jax.random.split(root, 3)

    params = init_params(k_par)

    # input side: random tokens, two trailing pads per row
    input_ids = jax.random.randint(k_in, (B, S), 3, VOCAB)
    input_ids = input_ids.at[:, -2:].set(PAD_ID)
    input_mask = (input_ids != PAD_ID).astype(jnp.int32)

    # output side: random tokens, eos(=2) then one trailing pad per row
    output_ids = jax.random.randint(k_out, (B, S), 3, VOCAB)
    output_ids = output_ids.at[:, -2].set(2)
    output_ids = output_ids.at[:, -1].set(PAD_ID)
    output_mask = (output_ids != PAD_ID).astype(jnp.int32)

    fwd = jax.jit(bart_lm_forward)
    logits = fwd(params, input_ids, output_ids, input_mask, output_mask)
    jax.block_until_ready(logits)

    assert logits.shape == (B, S, VOCAB), logits.shape
    assert jnp.isfinite(logits).all()
    print("KERNEL_OK")
</pallas_src>

<mosaic_0001>
module attributes {stable_mosaic.version = 11 : i64} {
  func.func @_matmul_kernel(%arg0: i32, %arg1: i32, %arg2: i32, %arg3: memref<16x128xf32, #tpu.memory_space<vmem>>, %arg4: memref<128x384xbf16, #tpu.memory_space<vmem>>, %arg5: memref<1x384xf32, #tpu.memory_space<vmem>>, %arg6: memref<16x384xbf16, #tpu.memory_space<vmem>>, %arg7: memref<16x384xf32, #tpu.memory_space<vmem>>) attributes {dimension_semantics = [#tpu.dimension_semantics<parallel>, #tpu.dimension_semantics<parallel>, #tpu.dimension_semantics<arbitrary>], iteration_bounds = array<i64: 1, 1, 1>, scalar_prefetch = 0 : i64, scratch_operands = 1 : i64, tpu.core_type = #tpu.core_type<tc>, window_params = [{transform_indices = @transform_0, window_bounds = array<i64: 16, 128>}, {transform_indices = @transform_1, window_bounds = array<i64: 128, 384>}, {transform_indices = @transform_2, window_bounds = array<i64: 1, 384>}, {transform_indices = @transform_3, window_bounds = array<i64: 16, 384>}]} {
    %c0_i32 = arith.constant 0 : i32
    %0 = arith.cmpi eq, %arg2, %c0_i32 : i32
    %1 = arith.extui %0 : i1 to i32
    %c0_i32_0 = arith.constant 0 : i32
    %2 = arith.cmpi ne, %1, %c0_i32_0 : i32
    scf.if %2 {
      %cst_10 = arith.constant 0.000000e+00 : f32
      %13 = vector.broadcast %cst_10 : f32 to vector<16x384xf32>
      %c0_11 = arith.constant 0 : index
      %c0_12 = arith.constant 0 : index
      %14 = vector.load %arg7[%c0_11, %c0_12] : memref<16x384xf32, #tpu.memory_space<vmem>>, vector<16x384xf32>
      tpu.vector_store %arg7[%c0_11, %c0_12], %13 {strides = array<i32>} : memref<16x384xf32, #tpu.memory_space<vmem>>, vector<16x384xf32>,
    } else {
    }
    %c0 = arith.constant 0 : index
    %c0_1 = arith.constant 0 : index
    %3 = vector.load %arg7[%c0, %c0_1] : memref<16x384xf32, #tpu.memory_space<vmem>>, vector<16x384xf32>
    %c0_2 = arith.constant 0 : index
    %c0_3 = arith.constant 0 : index
    %4 = vector.load %arg3[%c0_2, %c0_3] : memref<16x128xf32, #tpu.memory_space<vmem>>, vector<16x128xf32>
    %5 = arith.truncf %4 : vector<16x128xf32> to vector<16x128xbf16>
    %c0_4 = arith.constant 0 : index
    %c0_5 = arith.constant 0 : index
    %6 = vector.load %arg4[%c0_4, %c0_5] : memref<128x384xbf16, #tpu.memory_space<vmem>>, vector<128x384xbf16>
    %cst = arith.constant dense<0.000000e+00> : vector<16x384xf32>
    %7 = tpu.matmul %5, %6, %cst {dimension_numbers = #tpu.dot_dimension_numbers<[1], [0], [0], [1], [0, 0, 1, 1], [], []>} : vector<16x128xbf16>, vector<128x384xbf16>, vector<16x384xf32> -> vector<16x384xf32>
    %8 = arith.addf %3, %7 : vector<16x384xf32>
    %c0_6 = arith.constant 0 : index
    %c0_7 = arith.constant 0 : index
    %9 = vector.load %arg7[%c0_6, %c0_7] : memref<16x384xf32, #tpu.memory_space<vmem>>, vector<16x384xf32>
    tpu.vector_store %arg7[%c0_6, %c0_7], %8 {strides = array<i32>} : memref<16x384xf32, #tpu.memory_space<vmem>>, vector<16x384xf32>,
    %c0_i32_8 = arith.constant 0 : i32
    %10 = arith.cmpi eq, %arg2, %c0_i32_8 : i32
    %11 = arith.extui %10 : i1 to i32
    %c0_i32_9 = arith.constant 0 : i32
    %12 = arith.cmpi ne, %11, %c0_i32_9 : i32
    scf.if %12 {
      %c0_10 = arith.constant 0 : index
      %c0_11 = arith.constant 0 : index
      %13 = vector.load %arg7[%c0_10, %c0_11] : memref<16x384xf32, #tpu.memory_space<vmem>>, vector<16x384xf32>
      %c0_12 = arith.constant 0 : index
      %c0_13 = arith.constant 0 : index
      %14 = vector.load %arg5[%c0_12, %c0_13] : memref<1x384xf32, #tpu.memory_space<vmem>>, vector<1x384xf32>
      %15 = vector.broadcast %14 : vector<1x384xf32> to vector<16x384xf32>
      %16 = arith.addf %13, %15 : vector<16x384xf32>
      %17 = arith.truncf %16 : vector<16x384xf32> to vector<16x384xbf16>
      %c0_14 = arith.constant 0 : index
      %c0_15 = arith.constant 0 : index
      %18 = vector.load %arg6[%c0_14, %c0_15] : memref<16x384xbf16, #tpu.memory_space<vmem>>, vector<16x384xbf16>
      tpu.vector_store %arg6[%c0_14, %c0_15], %17 {strides = array<i32>} : memref<16x384xbf16, #tpu.memory_space<vmem>>, vector<16x384xbf16>,
    } else {
    }
    return
  }
  func.func @transform_0(%arg0: i32, %arg1: i32, %arg2: i32) -> (i32, i32) {
    %c0_i32 = arith.constant 0 : i32
    return %arg0, %arg2 : i32, i32
  }
  func.func @transform_1(%arg0: i32, %arg1: i32, %arg2: i32) -> (i32, i32) {
    %c0_i32 = arith.constant 0 : i32
    return %arg2, %arg1 : i32, i32
  }
  func.func @transform_2(%arg0: i32, %arg1: i32, %arg2: i32) -> (i32, i32) {
    %c0_i32 = arith.constant 0 : i32
    %c0_i32_0 = arith.constant 0 : i32
    return %c0_i32, %arg1 : i32, i32
  }
  func.func @transform_3(%arg0: i32, %arg1: i32, %arg2: i32) -> (i32, i32) {
    %c0_i32 = arith.constant 0 : i32
    return %arg0, %arg1 : i32, i32
  }
}

module attributes {stable_mosaic.version = 11 : i64} {
  func.func @_layernorm_kernel(%arg0: i32, %arg1: memref<16x128xf32, #tpu.memory_space<vmem>>, %arg2: memref<1x128xf32, #tpu.memory_space<vmem>>, %arg3: memref<1x128xf32, #tpu.memory_space<vmem>>, %arg4: memref<16x128xf32, #tpu.memory_space<vmem>>) attributes {dimension_semantics = [#tpu.dimension_semantics<parallel>], iteration_bounds = array<i64: 1>, scalar_prefetch = 0 : i64, scratch_operands = 0 : i64, tpu.core_type = #tpu.core_type<tc>, window_params = [{transform_indices = @transform_0, window_bounds = array<i64: 16, 128>}, {pipeline_mode = #tpu.pipeline_mode<synchronous>, transform_indices = @transform_1, window_bounds = array<i64: 1, 128>}, {pipeline_mode = #tpu.pipeline_mode<synchronous>, transform_indices = @transform_2, window_bounds = array<i64: 1, 128>}, {transform_indices = @transform_3, window_bounds = array<i64: 16, 128>}]} {
    %c0 = arith.constant 0 : index
    %c0_0 = arith.constant 0 : index
    %0 = vector.load %arg1[%c0, %c0_0] : memref<16x128xf32, #tpu.memory_space<vmem>>, vector<16x128xf32>
    %cst = arith.constant dense<0.000000e+00> : vector<16xf32>
    %1 = vector.multi_reduction <add>, %0, %cst [1] : vector<16x128xf32> to vector<16xf32>
    %2 = vector.shape_cast %1 : vector<16xf32> to vector<16x1xf32>
    %cst_1 = arith.constant 1.280000e+02 : f32
    %3 = vector.broadcast %cst_1 : f32 to vector<16x1xf32>
    %4 = arith.divf %2, %3 : vector<16x1xf32>
    %5 = vector.broadcast %4 : vector<16x1xf32> to vector<16x128xf32>
    %6 = arith.subf %0, %5 : vector<16x128xf32>
    %7 = arith.mulf %6, %6 : vector<16x128xf32>
    %cst_2 = arith.constant dense<0.000000e+00> : vector<16xf32>
    %8 = vector.multi_reduction <add>, %7, %cst_2 [1] : vector<16x128xf32> to vector<16xf32>
    %9 = vector.shape_cast %8 : vector<16xf32> to vector<16x1xf32>
    %cst_3 = arith.constant 1.280000e+02 : f32
    %10 = vector.broadcast %cst_3 : f32 to vector<16x1xf32>
    %11 = arith.divf %9, %10 : vector<16x1xf32>
    %12 = vector.broadcast %4 : vector<16x1xf32> to vector<16x128xf32>
    %13 = arith.subf %0, %12 : vector<16x128xf32>
    %cst_4 = arith.constant 9.99999974E-6 : f32
    %14 = vector.broadcast %cst_4 : f32 to vector<16x1xf32>
    %15 = arith.addf %11, %14 : vector<16x1xf32>
    %16 = math.rsqrt %15 : vector<16x1xf32>
    %17 = vector.broadcast %16 : vector<16x1xf32> to vector<16x128xf32>
    %18 = arith.mulf %13, %17 : vector<16x128xf32>
    %c0_5 = arith.constant 0 : index
    %c0_6 = arith.constant 0 : index
    %19 = vector.load %arg2[%c0_5, %c0_6] : memref<1x128xf32, #tpu.memory_space<vmem>>, vector<1x128xf32>
    %20 = vector.broadcast %19 : vector<1x128xf32> to vector<16x128xf32>
    %21 = arith.mulf %18, %20 : vector<16x128xf32>
    %c0_7 = arith.constant 0 : index
    %c0_8 = arith.constant 0 : index
    %22 = vector.load %arg3[%c0_7, %c0_8] : memref<1x128xf32, #tpu.memory_space<vmem>>, vector<1x128xf32>
    %23 = vector.broadcast %22 : vector<1x128xf32> to vector<16x128xf32>
    %24 = arith.addf %21, %23 : vector<16x128xf32>
    %c0_9 = arith.constant 0 : index
    %c0_10 = arith.constant 0 : index
    %25 = vector.load %arg4[%c0_9, %c0_10] : memref<16x128xf32, #tpu.memory_space<vmem>>, vector<16x128xf32>
    tpu.vector_store %arg4[%c0_9, %c0_10], %24 {strides = array<i32>} : memref<16x128xf32, #tpu.memory_space<vmem>>, vector<16x128xf32>,
    return
  }
  func.func @transform_0(%arg0: i32) -> (i32, i32) {
    %c0_i32 = arith.constant 0 : i32
    %c0_i32_0 = arith.constant 0 : i32
    return %arg0, %c0_i32 : i32, i32
  }
  func.func @transform_1(%arg0: i32) -> (i32, i32) {
    %c0_i32 = arith.constant 0 : i32
    %c0_i32_0 = arith.constant 0 : i32
    %c0_i32_1 = arith.constant 0 : i32
    return %c0_i32, %c0_i32_0 : i32, i32
  }
  func.func @transform_2(%arg0: i32) -> (i32, i32) {
    %c0_i32 = arith.constant 0 : i32
    %c0_i32_0 = arith.constant 0 : i32
    %c0_i32_1 = arith.constant 0 : i32
    return %c0_i32, %c0_i32_0 : i32, i32
  }
  func.func @transform_3(%arg0: i32) -> (i32, i32) {
    %c0_i32 = arith.constant 0 : i32
    %c0_i32_0 = arith.constant 0 : i32
    return %arg0, %c0_i32 : i32, i32
  }
}

module attributes {stable_mosaic.version = 11 : i64} {
  func.func @_mha_kernel(%arg0: i32, %arg1: i32, %arg2: memref<1x4x8x32xbf16, #tpu.memory_space<vmem>>, %arg3: memref<1x4x8x32xbf16, #tpu.memory_space<vmem>>, %arg4: memref<1x4x8x32xbf16, #tpu.memory_space<vmem>>, %arg5: memref<1x1x8xf32, #tpu.memory_space<vmem>>, %arg6: memref<1x4x8x32xbf16, #tpu.memory_space<vmem>>) attributes {dimension_semantics = [#tpu.dimension_semantics<parallel>, #tpu.dimension_semantics<parallel>], iteration_bounds = array<i64: 2, 1>, scalar_prefetch = 0 : i64, scratch_operands = 0 : i64, tpu.core_type = #tpu.core_type<tc>, window_params = [{transform_indices = @transform_0, window_bounds = array<i64: 1, 4, 8, 32>}, {transform_indices = @transform_1, window_bounds = array<i64: 1, 4, 8, 32>}, {transform_indices = @transform_2, window_bounds = array<i64: 1, 4, 8, 32>}, {transform_indices = @transform_3, window_bounds = array<i64: 1, 1, 8>}, {transform_indices = @transform_4, window_bounds = array<i64: 1, 4, 8, 32>}]} {
    %c0 = arith.constant 0 : index
    %c0_0 = arith.constant 0 : index
    %c0_1 = arith.constant 0 : index
    %c0_2 = arith.constant 0 : index
    %0 = vector.load %arg2[%c0, %c0_0, %c0_1, %c0_2] : memref<1x4x8x32xbf16, #tpu.memory_space<vmem>>, vector<1x4x8x32xbf16>
    %1 = vector.shape_cast %0 : vector<1x4x8x32xbf16> to vector<4x8x32xbf16>
    %c0_3 = arith.constant 0 : index
    %c0_4 = arith.constant 0 : index
    %c0_5 = arith.constant 0 : index
    %c0_6 = arith.constant 0 : index
    %2 = vector.load %arg3[%c0_3, %c0_4, %c0_5, %c0_6] : memref<1x4x8x32xbf16, #tpu.memory_space<vmem>>, vector<1x4x8x32xbf16>
    %3 = vector.shape_cast %2 : vector<1x4x8x32xbf16> to vector<4x8x32xbf16>
    %c0_7 = arith.constant 0 : index
    %c0_8 = arith.constant 0 : index
    %c0_9 = arith.constant 0 : index
    %c0_10 = arith.constant 0 : index
    %4 = vector.load %arg4[%c0_7, %c0_8, %c0_9, %c0_10] : memref<1x4x8x32xbf16, #tpu.memory_space<vmem>>, vector<1x4x8x32xbf16>
    %5 = vector.shape_cast %4 : vector<1x4x8x32xbf16> to vector<4x8x32xbf16>
    "tpu.trace_start"() <{level = 10 : i32, message = "hqd,hkd->hqk"}> : () -> ()
    %cst = arith.constant dense<0.000000e+00> : vector<4x8x8xf32>
    %6 = tpu.matmul %1, %3, %cst {dimension_numbers = #tpu.dot_dimension_numbers<[2], [2], [1], [1], [0, 0, 0, 1, 1, 1], [0], [0]>} : vector<4x8x32xbf16>, vector<4x8x32xbf16>, vector<4x8x8xf32> -> vector<4x8x8xf32>
    "tpu.trace_stop"() : () -> ()
    %cst_11 = arith.constant 0.176776692 : f32
    %7 = vector.broadcast %cst_11 : f32 to vector<4x8x8xf32>
    %8 = arith.mulf %6, %7 : vector<4x8x8xf32>
    %c0_12 = arith.constant 0 : index
    %c0_13 = arith.constant 0 : index
    %c0_14 = arith.constant 0 : index
    %9 = vector.load %arg5[%c0_12, %c0_13, %c0_14] : memref<1x1x8xf32, #tpu.memory_space<vmem>>, vector<1x1x8xf32>
    %10 = vector.shape_cast %9 : vector<1x1x8xf32> to vector<1x8xf32>
    %11 = vector.shape_cast %10 : vector<1x8xf32> to vector<1x1x8xf32>
    %12 = vector.broadcast %11 : vector<1x1x8xf32> to vector<4x8x8xf32>
    %13 = arith.addf %8, %12 : vector<4x8x8xf32>
    %c8_i32 = arith.constant 8 : i32
    %14 = arith.muli %arg1, %c8_i32 : i32
    %15 = tpu.iota {dimensions = array<i32: 0>} : vector<8x8xi32>
    %16 = vector.broadcast %14 : i32 to vector<8x8xi32>
    %17 = arith.addi %16, %15 : vector<8x8xi32>
    %18 = tpu.iota {dimensions = array<i32: 1>} : vector<8x8xi32>
    %19 = arith.cmpi sgt, %18, %17 : vector<8x8xi32>
    %20 = vector.shape_cast %19 : vector<8x8xi1> to vector<1x8x8xi1>
    %cst_15 = arith.constant -1.000000e+09 : f32
    %21 = vector.shape_cast %20 : vector<1x8x8xi1> to vector<1x8x8xi1>
    %22 = vector.broadcast %21 : vector<1x8x8xi1> to vector<4x8x8xi1>
    %23 = vector.broadcast %cst_15 : f32 to vector<4x8x8xf32>
    %24 = arith.select %22, %23, %13 : vector<4x8x8xi1>, vector<4x8x8xf32>
    %cst_16 = arith.constant dense<0xFF800000> : vector<4x8xf32>
    %25 = vector.multi_reduction <maximumf>, %24, %cst_16 [2] : vector<4x8x8xf32> to vector<4x8xf32>
    %26 = vector.shape_cast %25 : vector<4x8xf32> to vector<4x8x1xf32>
    %27 = vector.broadcast %26 : vector<4x8x1xf32> to vector<4x8x8xf32>
    %28 = arith.subf %24, %27 : vector<4x8x8xf32>
    %29 = math.exp %28 : vector<4x8x8xf32>
    %cst_17 = arith.constant dense<0.000000e+00> : vector<4x8xf32>
    %30 = vector.multi_reduction <add>, %29, %cst_17 [2] : vector<4x8x8xf32> to vector<4x8xf32>
    %31 = vector.shape_cast %30 : vector<4x8xf32> to vector<4x8x1xf32>
    %32 = tpu.reciprocal %31 {approx = true} : vector<4x8x1xf32> -> vector<4x8x1xf32>
    %33 = vector.broadcast %32 : vector<4x8x1xf32> to vector<4x8x8xf32>
    %34 = arith.mulf %29, %33 : vector<4x8x8xf32>
    %35 = arith.truncf %34 : vector<4x8x8xf32> to vector<4x8x8xbf16>
    "tpu.trace_start"() <{level = 10 : i32, message = "hqk,hkd->hqd"}> : () -> ()
    %cst_18 = arith.constant dense<0.000000e+00> : vector<4x8x32xf32>
    %36 = tpu.matmul %35, %5, %cst_18 {dimension_numbers = #tpu.dot_dimension_numbers<[2], [1], [1], [2], [0, 0, 0, 1, 1, 2], [0], [0]>} : vector<4x8x8xbf16>, vector<4x8x32xbf16>, vector<4x8x32xf32> -> vector<4x8x32xf32>
    "tpu.trace_stop"() : () -> ()
    %37 = arith.truncf %36 : vector<4x8x32xf32> to vector<4x8x32xbf16>
    %c0_19 = arith.constant 0 : index
    %c0_20 = arith.constant 0 : index
    %c0_21 = arith.constant 0 : index
    %c0_22 = arith.constant 0 : index
    %38 = vector.load %arg6[%c0_19, %c0_20, %c0_21, %c0_22] : memref<1x4x8x32xbf16, #tpu.memory_space<vmem>>, vector<1x4x8x32xbf16>
    %39 = vector.shape_cast %38 : vector<1x4x8x32xbf16> to vector<4x8x32xbf16>
    %40 = vector.shape_cast %37 : vector<4x8x32xbf16> to vector<1x4x8x32xbf16>
    tpu.vector_store %arg6[%c0_19, %c0_20, %c0_21, %c0_22], %40 {strides = array<i32>} : memref<1x4x8x32xbf16, #tpu.memory_space<vmem>>, vector<1x4x8x32xbf16>,
    return
  }
  func.func @transform_0(%arg0: i32, %arg1: i32) -> (i32, i32, i32, i32) {
    %c0_i32 = arith.constant 0 : i32
    %c0_i32_0 = arith.constant 0 : i32
    %c0_i32_1 = arith.constant 0 : i32
    return %arg0, %c0_i32, %arg1, %c0_i32_0 : i32, i32, i32, i32
  }
  func.func @transform_1(%arg0: i32, %arg1: i32) -> (i32, i32, i32, i32) {
    %c0_i32 = arith.constant 0 : i32
    %c0_i32_0 = arith.constant 0 : i32
    %c0_i32_1 = arith.constant 0 : i32
    %c0_i32_2 = arith.constant 0 : i32
    return %arg0, %c0_i32, %c0_i32_0, %c0_i32_1 : i32, i32, i32, i32
  }
  func.func @transform_2(%arg0: i32, %arg1: i32) -> (i32, i32, i32, i32) {
    %c0_i32 = arith.constant 0 : i32
    %c0_i32_0 = arith.constant 0 : i32
    %c0_i32_1 = arith.constant 0 : i32
    %c0_i32_2 = arith.constant 0 : i32
    return %arg0, %c0_i32, %c0_i32_0, %c0_i32_1 : i32, i32, i32, i32
  }
  func.func @transform_3(%arg0: i32, %arg1: i32) -> (i32, i32, i32) {
    %c0_i32 = arith.constant 0 : i32
    %c0_i32_0 = arith.constant 0 : i32
    %c0_i32_1 = arith.constant 0 : i32
    return %arg0, %c0_i32, %c0_i32_0 : i32, i32, i32
  }
  func.func @transform_4(%arg0: i32, %arg1: i32) -> (i32, i32, i32, i32) {
    %c0_i32 = arith.constant 0 : i32
    %c0_i32_0 = arith.constant 0 : i32
    %c0_i32_1 = arith.constant 0 : i32
    return %arg0, %c0_i32, %arg1, %c0_i32_0 : i32, i32, i32, i32
  }
}

module attributes {stable_mosaic.version = 11 : i64} {
  func.func @_matmul_kernel(%arg0: i32, %arg1: i32, %arg2: i32, %arg3: memref<16x128xf32, #tpu.memory_space<vmem>>, %arg4: memref<128x128xbf16, #tpu.memory_space<vmem>>, %arg5: memref<1x128xf32, #tpu.memory_space<vmem>>, %arg6: memref<16x128xbf16, #tpu.memory_space<vmem>>, %arg7: memref<16x128xf32, #tpu.memory_space<vmem>>) attributes {dimension_semantics = [#tpu.dimension_semantics<parallel>, #tpu.dimension_semantics<parallel>, #tpu.dimension_semantics<arbitrary>], iteration_bounds = array<i64: 1, 1, 1>, scalar_prefetch = 0 : i64, scratch_operands = 1 : i64, tpu.core_type = #tpu.core_type<tc>, window_params = [{transform_indices = @transform_0, window_bounds = array<i64: 16, 128>}, {transform_indices = @transform_1, window_bounds = array<i64: 128, 128>}, {transform_indices = @transform_2, window_bounds = array<i64: 1, 128>}, {transform_indices = @transform_3, window_bounds = array<i64: 16, 128>}]} {
    %c0_i32 = arith.constant 0 : i32
    %0 = arith.cmpi eq, %arg2, %c0_i32 : i32
    %1 = arith.extui %0 : i1 to i32
    %c0_i32_0 = arith.constant 0 : i32
    %2 = arith.cmpi ne, %1, %c0_i32_0 : i32
    scf.if %2 {
      %cst_10 = arith.constant 0.000000e+00 : f32
      %13 = vector.broadcast %cst_10 : f32 to vector<16x128xf32>
      %c0_11 = arith.constant 0 : index
      %c0_12 = arith.constant 0 : index
      %14 = vector.load %arg7[%c0_11, %c0_12] : memref<16x128xf32, #tpu.memory_space<vmem>>, vector<16x128xf32>
      tpu.vector_store %arg7[%c0_11, %c0_12], %13 {strides = array<i32>} : memref<16x128xf32, #tpu.memory_space<vmem>>, vector<16x128xf32>,
    } else {
    }
    %c0 = arith.constant 0 : index
    %c0_1 = arith.constant 0 : index
    %3 = vector.load %arg7[%c0, %c0_1] : memref<16x128xf32, #tpu.memory_space<vmem>>, vector<16x128xf32>
    %c0_2 = arith.constant 0 : index
    %c0_3 = arith.constant 0 : index
    %4 = vector.load %arg3[%c0_2, %c0_3] : memref<16x128xf32, #tpu.memory_space<vmem>>, vector<16x128xf32>
    %5 = arith.truncf %4 : vector<16x128xf32> to vector<16x128xbf16>
    %c0_4 = arith.constant 0 : index
    %c0_5 = arith.constant 0 : index
    %6 = vector.load %arg4[%c0_4, %c0_5] : memref<128x128xbf16, #tpu.memory_space<vmem>>, vector<128x128xbf16>
    %cst = arith.constant dense<0.000000e+00> : vector<16x128xf32>
    %7 = tpu.matmul %5, %6, %cst {dimension_numbers = #tpu.dot_dimension_numbers<[1], [0], [0], [1], [0, 0, 1, 1], [], []>} : vector<16x128xbf16>, vector<128x128xbf16>, vector<16x128xf32> -> vector<16x128xf32>
    %8 = arith.addf %3, %7 : vector<16x128xf32>
    %c0_6 = arith.constant 0 : index
    %c0_7 = arith.constant 0 : index
    %9 = vector.load %arg7[%c0_6, %c0_7] : memref<16x128xf32, #tpu.memory_space<vmem>>, vector<16x128xf32>
    tpu.vector_store %arg7[%c0_6, %c0_7], %8 {strides = array<i32>} : memref<16x128xf32, #tpu.memory_space<vmem>>, vector<16x128xf32>,
    %c0_i32_8 = arith.constant 0 : i32
    %10 = arith.cmpi eq, %arg2, %c0_i32_8 : i32
    %11 = arith.extui %10 : i1 to i32
    %c0_i32_9 = arith.constant 0 : i32
    %12 = arith.cmpi ne, %11, %c0_i32_9 : i32
    scf.if %12 {
      %c0_10 = arith.constant 0 : index
      %c0_11 = arith.constant 0 : index
      %13 = vector.load %arg7[%c0_10, %c0_11] : memref<16x128xf32, #tpu.memory_space<vmem>>, vector<16x128xf32>
      %c0_12 = arith.constant 0 : index
      %c0_13 = arith.constant 0 : index
      %14 = vector.load %arg5[%c0_12, %c0_13] : memref<1x128xf32, #tpu.memory_space<vmem>>, vector<1x128xf32>
      %15 = vector.broadcast %14 : vector<1x128xf32> to vector<16x128xf32>
      %16 = arith.addf %13, %15 : vector<16x128xf32>
      %17 = arith.truncf %16 : vector<16x128xf32> to vector<16x128xbf16>
      %c0_14 = arith.constant 0 : index
      %c0_15 = arith.constant 0 : index
      %18 = vector.load %arg6[%c0_14, %c0_15] : memref<16x128xbf16, #tpu.memory_space<vmem>>, vector<16x128xbf16>
      tpu.vector_store %arg6[%c0_14, %c0_15], %17 {strides = array<i32>} : memref<16x128xbf16, #tpu.memory_space<vmem>>, vector<16x128xbf16>,
    } else {
    }
    return
  }
  func.func @transform_0(%arg0: i32, %arg1: i32, %arg2: i32) -> (i32, i32) {
    %c0_i32 = arith.constant 0 : i32
    return %arg0, %arg2 : i32, i32
  }
  func.func @transform_1(%arg0: i32, %arg1: i32, %arg2: i32) -> (i32, i32) {
    %c0_i32 = arith.constant 0 : i32
    return %arg2, %arg1 : i32, i32
  }
  func.func @transform_2(%arg0: i32, %arg1: i32, %arg2: i32) -> (i32, i32) {
    %c0_i32 = arith.constant 0 : i32
    %c0_i32_0 = arith.constant 0 : i32
    return %c0_i32, %arg1 : i32, i32
  }
  func.func @transform_3(%arg0: i32, %arg1: i32, %arg2: i32) -> (i32, i32) {
    %c0_i32 = arith.constant 0 : i32
    return %arg0, %arg1 : i32, i32
  }
}

module attributes {stable_mosaic.version = 11 : i64} {
  func.func @_proj_res_ln_kernel(%arg0: i32, %arg1: memref<16x128xbf16, #tpu.memory_space<vmem>>, %arg2: memref<128x128xbf16, #tpu.memory_space<vmem>>, %arg3: memref<1x128xf32, #tpu.memory_space<vmem>>, %arg4: memref<16x128xf32, #tpu.memory_space<vmem>>, %arg5: memref<1x128xf32, #tpu.memory_space<vmem>>, %arg6: memref<1x128xf32, #tpu.memory_space<vmem>>, %arg7: memref<16x128xf32, #tpu.memory_space<vmem>>) attributes {dimension_semantics = [#tpu.dimension_semantics<parallel>], iteration_bounds = array<i64: 1>, scalar_prefetch = 0 : i64, scratch_operands = 0 : i64, tpu.core_type = #tpu.core_type<tc>, window_params = [{transform_indices = @transform_0, window_bounds = array<i64: 16, 128>}, {pipeline_mode = #tpu.pipeline_mode<synchronous>, transform_indices = @transform_1, window_bounds = array<i64: 128, 128>}, {pipeline_mode = #tpu.pipeline_mode<synchronous>, transform_indices = @transform_2, window_bounds = array<i64: 1, 128>}, {transform_indices = @transform_3, window_bounds = array<i64: 16, 128>}, {pipeline_mode = #tpu.pipeline_mode<synchronous>, transform_indices = @transform_4, window_bounds = array<i64: 1, 128>}, {pipeline_mode = #tpu.pipeline_mode<synchronous>, transform_indices = @transform_5, window_bounds = array<i64: 1, 128>}, {transform_indices = @transform_6, window_bounds = array<i64: 16, 128>}]} {
    %c0 = arith.constant 0 : index
    %c0_0 = arith.constant 0 : index
    %0 = vector.load %arg1[%c0, %c0_0] : memref<16x128xbf16, #tpu.memory_space<vmem>>, vector<16x128xbf16>
    %c0_1 = arith.constant 0 : index
    %c0_2 = arith.constant 0 : index
    %1 = vector.load %arg2[%c0_1, %c0_2] : memref<128x128xbf16, #tpu.memory_space<vmem>>, vector<128x128xbf16>
    %cst = arith.constant dense<0.000000e+00> : vector<16x128xf32>
    %2 = tpu.matmul %0, %1, %cst {dimension_numbers = #tpu.dot_dimension_numbers<[1], [0], [0], [1], [0, 0, 1, 1], [], []>} : vector<16x128xbf16>, vector<128x128xbf16>, vector<16x128xf32> -> vector<16x128xf32>
    %c0_3 = arith.constant 0 : index
    %c0_4 = arith.constant 0 : index
    %3 = vector.load %arg3[%c0_3, %c0_4] : memref<1x128xf32, #tpu.memory_space<vmem>>, vector<1x128xf32>
    %4 = vector.broadcast %3 : vector<1x128xf32> to vector<16x128xf32>
    %5 = arith.addf %2, %4 : vector<16x128xf32>
    %c0_5 = arith.constant 0 : index
    %c0_6 = arith.constant 0 : index
    %6 = vector.load %arg4[%c0_5, %c0_6] : memref<16x128xf32, #tpu.memory_space<vmem>>, vector<16x128xf32>
    %7 = arith.addf %5, %6 : vector<16x128xf32>
    %cst_7 = arith.constant dense<0.000000e+00> : vector<16xf32>
    %8 = vector.multi_reduction <add>, %7, %cst_7 [1] : vector<16x128xf32> to vector<16xf32>
    %9 = vector.shape_cast %8 : vector<16xf32> to vector<16x1xf32>
    %cst_8 = arith.constant 1.280000e+02 : f32
    %10 = vector.broadcast %cst_8 : f32 to vector<16x1xf32>
    %11 = arith.divf %9, %10 : vector<16x1xf32>
    %12 = vector.broadcast %11 : vector<16x1xf32> to vector<16x128xf32>
    %13 = arith.subf %7, %12 : vector<16x128xf32>
    %14 = arith.mulf %13, %13 : vector<16x128xf32>
    %cst_9 = arith.constant dense<0.000000e+00> : vector<16xf32>
    %15 = vector.multi_reduction <add>, %14, %cst_9 [1] : vector<16x128xf32> to vector<16xf32>
    %16 = vector.shape_cast %15 : vector<16xf32> to vector<16x1xf32>
    %cst_10 = arith.constant 1.280000e+02 : f32
    %17 = vector.broadcast %cst_10 : f32 to vector<16x1xf32>
    %18 = arith.divf %16, %17 : vector<16x1xf32>
    %19 = vector.broadcast %11 : vector<16x1xf32> to vector<16x128xf32>
    %20 = arith.subf %7, %19 : vector<16x128xf32>
    %cst_11 = arith.constant 9.99999974E-6 : f32
    %21 = vector.broadcast %cst_11 : f32 to vector<16x1xf32>
    %22 = arith.addf %18, %21 : vector<16x1xf32>
    %23 = math.rsqrt %22 : vector<16x1xf32>
    %24 = vector.broadcast %23 : vector<16x1xf32> to vector<16x128xf32>
    %25 = arith.mulf %20, %24 : vector<16x128xf32>
    %c0_12 = arith.constant 0 : index
    %c0_13 = arith.constant 0 : index
    %26 = vector.load %arg5[%c0_12, %c0_13] : memref<1x128xf32, #tpu.memory_space<vmem>>, vector<1x128xf32>
    %27 = vector.broadcast %26 : vector<1x128xf32> to vector<16x128xf32>
    %28 = arith.mulf %25, %27 : vector<16x128xf32>
    %c0_14 = arith.constant 0 : index
    %c0_15 = arith.constant 0 : index
    %29 = vector.load %arg6[%c0_14, %c0_15] : memref<1x128xf32, #tpu.memory_space<vmem>>, vector<1x128xf32>
    %30 = vector.broadcast %29 : vector<1x128xf32> to vector<16x128xf32>
    %31 = arith.addf %28, %30 : vector<16x128xf32>
    %c0_16 = arith.constant 0 : index
    %c0_17 = arith.constant 0 : index
    %32 = vector.load %arg7[%c0_16, %c0_17] : memref<16x128xf32, #tpu.memory_space<vmem>>, vector<16x128xf32>
    tpu.vector_store %arg7[%c0_16, %c0_17], %31 {strides = array<i32>} : memref<16x128xf32, #tpu.memory_space<vmem>>, vector<16x128xf32>,
    return
  }
  func.func @transform_0(%arg0: i32) -> (i32, i32) {
    %c0_i32 = arith.constant 0 : i32
    %c0_i32_0 = arith.constant 0 : i32
    return %arg0, %c0_i32 : i32, i32
  }
  func.func @transform_1(%arg0: i32) -> (i32, i32) {
    %c0_i32 = arith.constant 0 : i32
    %c0_i32_0 = arith.constant 0 : i32
    %c0_i32_1 = arith.constant 0 : i32
    return %c0_i32, %c0_i32_0 : i32, i32
  }
  func.func @transform_2(%arg0: i32) -> (i32, i32) {
    %c0_i32 = arith.constant 0 : i32
    %c0_i32_0 = arith.constant 0 : i32
    %c0_i32_1 = arith.constant 0 : i32
    return %c0_i32, %c0_i32_0 : i32, i32
  }
  func.func @transform_3(%arg0: i32) -> (i32, i32) {
    %c0_i32 = arith.constant 0 : i32
    %c0_i32_0 = arith.constant 0 : i32
    return %arg0, %c0_i32 : i32, i32
  }
  func.func @transform_4(%arg0: i32) -> (i32, i32) {
    %c0_i32 = arith.constant 0 : i32
    %c0_i32_0 = arith.constant 0 : i32
    %c0_i32_1 = arith.constant 0 : i32
    return %c0_i32, %c0_i32_0 : i32, i32
  }
  func.func @transform_5(%arg0: i32) -> (i32, i32) {
    %c0_i32 = arith.constant 0 : i32
    %c0_i32_0 = arith.constant 0 : i32
    %c0_i32_1 = arith.constant 0 : i32
    return %c0_i32, %c0_i32_0 : i32, i32
  }
  func.func @transform_6(%arg0: i32) -> (i32, i32) {
    %c0_i32 = arith.constant 0 : i32
    %c0_i32_0 = arith.constant 0 : i32
    return %arg0, %c0_i32 : i32, i32
  }
}

module attributes {stable_mosaic.version = 11 : i64} {
  func.func @_ffn_res_ln_kernel(%arg0: i32, %arg1: i32, %arg2: memref<16x128xf32, #tpu.memory_space<vmem>>, %arg3: memref<128x256xbf16, #tpu.memory_space<vmem>>, %arg4: memref<1x256xf32, #tpu.memory_space<vmem>>, %arg5: memref<256x128xbf16, #tpu.memory_space<vmem>>, %arg6: memref<1x128xf32, #tpu.memory_space<vmem>>, %arg7: memref<1x128xf32, #tpu.memory_space<vmem>>, %arg8: memref<1x128xf32, #tpu.memory_space<vmem>>, %arg9: memref<16x128xf32, #tpu.memory_space<vmem>>, %arg10: memref<16x128xf32, #tpu.memory_space<vmem>>) attributes {dimension_semantics = [#tpu.dimension_semantics<parallel>, #tpu.dimension_semantics<arbitrary>], iteration_bounds = array<i64: 1, 1>, scalar_prefetch = 0 : i64, scratch_operands = 1 : i64, tpu.core_type = #tpu.core_type<tc>, window_params = [{transform_indices = @transform_0, window_bounds = array<i64: 16, 128>}, {transform_indices = @transform_1, window_bounds = array<i64: 128, 256>}, {transform_indices = @transform_2, window_bounds = array<i64: 1, 256>}, {transform_indices = @transform_3, window_bounds = array<i64: 256, 128>}, {pipeline_mode = #tpu.pipeline_mode<synchronous>, transform_indices = @transform_4, window_bounds = array<i64: 1, 128>}, {pipeline_mode = #tpu.pipeline_mode<synchronous>, transform_indices = @transform_5, window_bounds = array<i64: 1, 128>}, {pipeline_mode = #tpu.pipeline_mode<synchronous>, transform_indices = @transform_6, window_bounds = array<i64: 1, 128>}, {transform_indices = @transform_7, window_bounds = array<i64: 16, 128>}]} {
    %c0_i32 = arith.constant 0 : i32
    %0 = arith.cmpi eq, %arg1, %c0_i32 : i32
    %1 = arith.extui %0 : i1 to i32
    %c0_i32_0 = arith.constant 0 : i32
    %2 = arith.cmpi ne, %1, %c0_i32_0 : i32
    scf.if %2 {
      %cst_18 = arith.constant 0.000000e+00 : f32
      %27 = vector.broadcast %cst_18 : f32 to vector<16x128xf32>
      %c0_19 = arith.constant 0 : index
      %c0_20 = arith.constant 0 : index
      %28 = vector.load %arg10[%c0_19, %c0_20] : memref<16x128xf32, #tpu.memory_space<vmem>>, vector<16x128xf32>
      tpu.vector_store %arg10[%c0_19, %c0_20], %27 {strides = array<i32>} : memref<16x128xf32, #tpu.memory_space<vmem>>, vector<16x128xf32>,
    } else {
    }
    %c0 = arith.constant 0 : index
    %c0_1 = arith.constant 0 : index
    %3 = vector.load %arg2[%c0, %c0_1] : memref<16x128xf32, #tpu.memory_space<vmem>>, vector<16x128xf32>
    %4 = arith.truncf %3 : vector<16x128xf32> to vector<16x128xbf16>
    %c0_2 = arith.constant 0 : index
    %c0_3 = arith.constant 0 : index
    %5 = vector.load %arg3[%c0_2, %c0_3] : memref<128x256xbf16, #tpu.memory_space<vmem>>, vector<128x256xbf16>
    %cst = arith.constant dense<0.000000e+00> : vector<16x256xf32>
    %6 = tpu.matmul %4, %5, %cst {dimension_numbers = #tpu.dot_dimension_numbers<[1], [0], [0], [1], [0, 0, 1, 1], [], []>} : vector<16x128xbf16>, vector<128x256xbf16>, vector<16x256xf32> -> vector<16x256xf32>
    %c0_4 = arith.constant 0 : index
    %c0_5 = arith.constant 0 : index
    %7 = vector.load %arg4[%c0_4, %c0_5] : memref<1x256xf32, #tpu.memory_space<vmem>>, vector<1x256xf32>
    %8 = vector.broadcast %7 : vector<1x256xf32> to vector<16x256xf32>
    %9 = arith.addf %6, %8 : vector<16x256xf32>
    %cst_6 = arith.constant 5.000000e-01 : f32
    %10 = vector.broadcast %cst_6 : f32 to vector<16x256xf32>
    %11 = arith.mulf %10, %9 : vector<16x256xf32>
    %cst_7 = arith.constant 0.707106769 : f32
    %12 = vector.broadcast %cst_7 : f32 to vector<16x256xf32>
    %13 = arith.mulf %9, %12 : vector<16x256xf32>
    %14 = math.erf %13 : vector<16x256xf32>
    %cst_8 = arith.constant 1.000000e+00 : f32
    %15 = vector.broadcast %cst_8 : f32 to vector<16x256xf32>
    %16 = arith.addf %15, %14 : vector<16x256xf32>
    %17 = arith.mulf %11, %16 : vector<16x256xf32>
    %c0_9 = arith.constant 0 : index
    %c0_10 = arith.constant 0 : index
    %18 = vector.load %arg10[%c0_9, %c0_10] : memref<16x128xf32, #tpu.memory_space<vmem>>, vector<16x128xf32>
    %19 = arith.truncf %17 : vector<16x256xf32> to vector<16x256xbf16>
    %c0_11 = arith.constant 0 : index
    %c0_12 = arith.constant 0 : index
    %20 = vector.load %arg5[%c0_11, %c0_12] : memref<256x128xbf16, #tpu.memory_space<vmem>>, vector<256x128xbf16>
    %cst_13 = arith.constant dense<0.000000e+00> : vector<16x128xf32>
    %21 = tpu.matmul %19, %20, %cst_13 {dimension_numbers = #tpu.dot_dimension_numbers<[1], [0], [0], [1], [0, 0, 1, 1], [], []>} : vector<16x256xbf16>, vector<256x128xbf16>, vector<16x128xf32> -> vector<16x128xf32>
    %22 = arith.addf %18, %21 : vector<16x128xf32>
    %c0_14 = arith.constant 0 : index
    %c0_15 = arith.constant 0 : index
    %23 = vector.load %arg10[%c0_14, %c0_15] : memref<16x128xf32, #tpu.memory_space<vmem>>, vector<16x128xf32>
    tpu.vector_store %arg10[%c0_14, %c0_15], %22 {strides = array<i32>} : memref<16x128xf32, #tpu.memory_space<vmem>>, vector<16x128xf32>,
    %c0_i32_16 = arith.constant 0 : i32
    %24 = arith.cmpi eq, %arg1, %c0_i32_16 : i32
    %25 = arith.extui %24 : i1 to i32
    %c0_i32_17 = arith.constant 0 : i32
    %26 = arith.cmpi ne, %25, %c0_i32_17 : i32
    scf.if %26 {
      %c0_18 = arith.constant 0 : index
      %c0_19 = arith.constant 0 : index
      %27 = vector.load %arg10[%c0_18, %c0_19] : memref<16x128xf32, #tpu.memory_space<vmem>>, vector<16x128xf32>
      %c0_20 = arith.constant 0 : index
      %c0_21 = arith.constant 0 : index
      %28 = vector.load %arg6[%c0_20, %c0_21] : memref<1x128xf32, #tpu.memory_space<vmem>>, vector<1x128xf32>
      %29 = vector.broadcast %28 : vector<1x128xf32> to vector<16x128xf32>
      %30 = arith.addf %27, %29 : vector<16x128xf32>
      %31 = arith.addf %30, %3 : vector<16x128xf32>
      %cst_22 = arith.constant dense<0.000000e+00> : vector<16xf32>
      %32 = vector.multi_reduction <add>, %31, %cst_22 [1] : vector<16x128xf32> to vector<16xf32>
      %33 = vector.shape_cast %32 : vector<16xf32> to vector<16x1xf32>
      %cst_23 = arith.constant 1.280000e+02 : f32
      %34 = vector.broadcast %cst_23 : f32 to vector<16x1xf32>
      %35 = arith.divf %33, %34 : vector<16x1xf32>
      %36 = vector.broadcast %35 : vector<16x1xf32> to vector<16x128xf32>
      %37 = arith.subf %31, %36 : vector<16x128xf32>
      %38 = arith.mulf %37, %37 : vector<16x128xf32>
      %cst_24 = arith.constant dense<0.000000e+00> : vector<16xf32>
      %39 = vector.multi_reduction <add>, %38, %cst_24 [1] : vector<16x128xf32> to vector<16xf32>
      %40 = vector.shape_cast %39 : vector<16xf32> to vector<16x1xf32>
      %cst_25 = arith.constant 1.280000e+02 : f32
      %41 = vector.broadcast %cst_25 : f32 to vector<16x1xf32>
      %42 = arith.divf %40, %41 : vector<16x1xf32>
      %43 = vector.broadcast %35 : vector<16x1xf32> to vector<16x128xf32>
      %44 = arith.subf %31, %43 : vector<16x128xf32>
      %cst_26 = arith.constant 9.99999974E-6 : f32
      %45 = vector.broadcast %cst_26 : f32 to vector<16x1xf32>
      %46 = arith.addf %42, %45 : vector<16x1xf32>
      %47 = math.rsqrt %46 : vector<16x1xf32>
      %48 = vector.broadcast %47 : vector<16x1xf32> to vector<16x128xf32>
      %49 = arith.mulf %44, %48 : vector<16x128xf32>
      %c0_27 = arith.constant 0 : index
      %c0_28 = arith.constant 0 : index
      %50 = vector.load %arg7[%c0_27, %c0_28] : memref<1x128xf32, #tpu.memory_space<vmem>>, vector<1x128xf32>
      %51 = vector.broadcast %50 : vector<1x128xf32> to vector<16x128xf32>
      %52 = arith.mulf %49, %51 : vector<16x128xf32>
      %c0_29 = arith.constant 0 : index
      %c0_30 = arith.constant 0 : index
      %53 = vector.load %arg8[%c0_29, %c0_30] : memref<1x128xf32, #tpu.memory_space<vmem>>, vector<1x128xf32>
      %54 = vector.broadcast %53 : vector<1x128xf32> to vector<16x128xf32>
      %55 = arith.addf %52, %54 : vector<16x128xf32>
      %c0_31 = arith.constant 0 : index
      %c0_32 = arith.constant 0 : index
      %56 = vector.load %arg9[%c0_31, %c0_32] : memref<16x128xf32, #tpu.memory_space<vmem>>, vector<16x128xf32>
      tpu.vector_store %arg9[%c0_31, %c0_32], %55 {strides = array<i32>} : memref<16x128xf32, #tpu.memory_space<vmem>>, vector<16x128xf32>,
    } else {
    }
    return
  }
  func.func @transform_0(%arg0: i32, %arg1: i32) -> (i32, i32) {
    %c0_i32 = arith.constant 0 : i32
    %c0_i32_0 = arith.constant 0 : i32
    return %arg0, %c0_i32 : i32, i32
  }
  func.func @transform_1(%arg0: i32, %arg1: i32) -> (i32, i32) {
    %c0_i32 = arith.constant 0 : i32
    %c0_i32_0 = arith.constant 0 : i32
    return %c0_i32, %arg1 : i32, i32
  }
  func.func @transform_2(%arg0: i32, %arg1: i32) -> (i32, i32) {
    %c0_i32 = arith.constant 0 : i32
    %c0_i32_0 = arith.constant 0 : i32
    return %c0_i32, %arg1 : i32, i32
  }
  func.func @transform_3(%arg0: i32, %arg1: i32) -> (i32, i32) {
    %c0_i32 = arith.constant 0 : i32
    %c0_i32_0 = arith.constant 0 : i32
    return %arg1, %c0_i32 : i32, i32
  }
  func.func @transform_4(%arg0: i32, %arg1: i32) -> (i32, i32) {
    %c0_i32 = arith.constant 0 : i32
    %c0_i32_0 = arith.constant 0 : i32
    %c0_i32_1 = arith.constant 0 : i32
    return %c0_i32, %c0_i32_0 : i32, i32
  }
  func.func @transform_5(%arg0: i32, %arg1: i32) -> (i32, i32) {
    %c0_i32 = arith.constant 0 : i32
    %c0_i32_0 = arith.constant 0 : i32
    %c0_i32_1 = arith.constant 0 : i32
    return %c0_i32, %c0_i32_0 : i32, i32
  }
  func.func @transform_6(%arg0: i32, %arg1: i32) -> (i32, i32) {
    %c0_i32 = arith.constant 0 : i32
    %c0_i32_0 = arith.constant 0 : i32
    %c0_i32_1 = arith.constant 0 : i32
    return %c0_i32, %c0_i32_0 : i32, i32
  }
  func.func @transform_7(%arg0: i32, %arg1: i32) -> (i32, i32) {
    %c0_i32 = arith.constant 0 : i32
    %c0_i32_0 = arith.constant 0 : i32
    return %arg0, %c0_i32 : i32, i32
  }
}

module attributes {stable_mosaic.version = 11 : i64} {
  func.func @_matmul_kernel(%arg0: i32, %arg1: i32, %arg2: i32, %arg3: memref<16x128xf32, #tpu.memory_space<vmem>>, %arg4: memref<128x256xbf16, #tpu.memory_space<vmem>>, %arg5: memref<1x256xf32, #tpu.memory_space<vmem>>, %arg6: memref<16x256xbf16, #tpu.memory_space<vmem>>, %arg7: memref<16x256xf32, #tpu.memory_space<vmem>>) attributes {dimension_semantics = [#tpu.dimension_semantics<parallel>, #tpu.dimension_semantics<parallel>, #tpu.dimension_semantics<arbitrary>], iteration_bounds = array<i64: 1, 1, 1>, scalar_prefetch = 0 : i64, scratch_operands = 1 : i64, tpu.core_type = #tpu.core_type<tc>, window_params = [{transform_indices = @transform_0, window_bounds = array<i64: 16, 128>}, {transform_indices = @transform_1, window_bounds = array<i64: 128, 256>}, {transform_indices = @transform_2, window_bounds = array<i64: 1, 256>}, {transform_indices = @transform_3, window_bounds = array<i64: 16, 256>}]} {
    %c0_i32 = arith.constant 0 : i32
    %0 = arith.cmpi eq, %arg2, %c0_i32 : i32
    %1 = arith.extui %0 : i1 to i32
    %c0_i32_0 = arith.constant 0 : i32
    %2 = arith.cmpi ne, %1, %c0_i32_0 : i32
    scf.if %2 {
      %cst_10 = arith.constant 0.000000e+00 : f32
      %13 = vector.broadcast %cst_10 : f32 to vector<16x256xf32>
      %c0_11 = arith.constant 0 : index
      %c0_12 = arith.constant 0 : index
      %14 = vector.load %arg7[%c0_11, %c0_12] : memref<16x256xf32, #tpu.memory_space<vmem>>, vector<16x256xf32>
      tpu.vector_store %arg7[%c0_11, %c0_12], %13 {strides = array<i32>} : memref<16x256xf32, #tpu.memory_space<vmem>>, vector<16x256xf32>,
    } else {
    }
    %c0 = arith.constant 0 : index
    %c0_1 = arith.constant 0 : index
    %3 = vector.load %arg7[%c0, %c0_1] : memref<16x256xf32, #tpu.memory_space<vmem>>, vector<16x256xf32>
    %c0_2 = arith.constant 0 : index
    %c0_3 = arith.constant 0 : index
    %4 = vector.load %arg3[%c0_2, %c0_3] : memref<16x128xf32, #tpu.memory_space<vmem>>, vector<16x128xf32>
    %5 = arith.truncf %4 : vector<16x128xf32> to vector<16x128xbf16>
    %c0_4 = arith.constant 0 : index
    %c0_5 = arith.constant 0 : index
    %6 = vector.load %arg4[%c0_4, %c0_5] : memref<128x256xbf16, #tpu.memory_space<vmem>>, vector<128x256xbf16>
    %cst = arith.constant dense<0.000000e+00> : vector<16x256xf32>
    %7 = tpu.matmul %5, %6, %cst {dimension_numbers = #tpu.dot_dimension_numbers<[1], [0], [0], [1], [0, 0, 1, 1], [], []>} : vector<16x128xbf16>, vector<128x256xbf16>, vector<16x256xf32> -> vector<16x256xf32>
    %8 = arith.addf %3, %7 : vector<16x256xf32>
    %c0_6 = arith.constant 0 : index
    %c0_7 = arith.constant 0 : index
    %9 = vector.load %arg7[%c0_6, %c0_7] : memref<16x256xf32, #tpu.memory_space<vmem>>, vector<16x256xf32>
    tpu.vector_store %arg7[%c0_6, %c0_7], %8 {strides = array<i32>} : memref<16x256xf32, #tpu.memory_space<vmem>>, vector<16x256xf32>,
    %c0_i32_8 = arith.constant 0 : i32
    %10 = arith.cmpi eq, %arg2, %c0_i32_8 : i32
    %11 = arith.extui %10 : i1 to i32
    %c0_i32_9 = arith.constant 0 : i32
    %12 = arith.cmpi ne, %11, %c0_i32_9 : i32
    scf.if %12 {
      %c0_10 = arith.constant 0 : index
      %c0_11 = arith.constant 0 : index
      %13 = vector.load %arg7[%c0_10, %c0_11] : memref<16x256xf32, #tpu.memory_space<vmem>>, vector<16x256xf32>
      %c0_12 = arith.constant 0 : index
      %c0_13 = arith.constant 0 : index
      %14 = vector.load %arg5[%c0_12, %c0_13] : memref<1x256xf32, #tpu.memory_space<vmem>>, vector<1x256xf32>
      %15 = vector.broadcast %14 : vector<1x256xf32> to vector<16x256xf32>
      %16 = arith.addf %13, %15 : vector<16x256xf32>
      %17 = arith.truncf %16 : vector<16x256xf32> to vector<16x256xbf16>
      %c0_14 = arith.constant 0 : index
      %c0_15 = arith.constant 0 : index
      %18 = vector.load %arg6[%c0_14, %c0_15] : memref<16x256xbf16, #tpu.memory_space<vmem>>, vector<16x256xbf16>
      tpu.vector_store %arg6[%c0_14, %c0_15], %17 {strides = array<i32>} : memref<16x256xbf16, #tpu.memory_space<vmem>>, vector<16x256xbf16>,
    } else {
    }
    return
  }
  func.func @transform_0(%arg0: i32, %arg1: i32, %arg2: i32) -> (i32, i32) {
    %c0_i32 = arith.constant 0 : i32
    return %arg0, %arg2 : i32, i32
  }
  func.func @transform_1(%arg0: i32, %arg1: i32, %arg2: i32) -> (i32, i32) {
    %c0_i32 = arith.constant 0 : i32
    return %arg2, %arg1 : i32, i32
  }
  func.func @transform_2(%arg0: i32, %arg1: i32, %arg2: i32) -> (i32, i32) {
    %c0_i32 = arith.constant 0 : i32
    %c0_i32_0 = arith.constant 0 : i32
    return %c0_i32, %arg1 : i32, i32
  }
  func.func @transform_3(%arg0: i32, %arg1: i32, %arg2: i32) -> (i32, i32) {
    %c0_i32 = arith.constant 0 : i32
    return %arg0, %arg1 : i32, i32
  }
}

module attributes {stable_mosaic.version = 11 : i64} {
  func.func @_mha_kernel(%arg0: i32, %arg1: i32, %arg2: memref<1x4x8x32xbf16, #tpu.memory_space<vmem>>, %arg3: memref<1x4x8x32xbf16, #tpu.memory_space<vmem>>, %arg4: memref<1x4x8x32xbf16, #tpu.memory_space<vmem>>, %arg5: memref<1x1x8xf32, #tpu.memory_space<vmem>>, %arg6: memref<1x4x8x32xbf16, #tpu.memory_space<vmem>>) attributes {dimension_semantics = [#tpu.dimension_semantics<parallel>, #tpu.dimension_semantics<parallel>], iteration_bounds = array<i64: 2, 1>, scalar_prefetch = 0 : i64, scratch_operands = 0 : i64, tpu.core_type = #tpu.core_type<tc>, window_params = [{transform_indices = @transform_0, window_bounds = array<i64: 1, 4, 8, 32>}, {transform_indices = @transform_1, window_bounds = array<i64: 1, 4, 8, 32>}, {transform_indices = @transform_2, window_bounds = array<i64: 1, 4, 8, 32>}, {transform_indices = @transform_3, window_bounds = array<i64: 1, 1, 8>}, {transform_indices = @transform_4, window_bounds = array<i64: 1, 4, 8, 32>}]} {
    %c0 = arith.constant 0 : index
    %c0_0 = arith.constant 0 : index
    %c0_1 = arith.constant 0 : index
    %c0_2 = arith.constant 0 : index
    %0 = vector.load %arg2[%c0, %c0_0, %c0_1, %c0_2] : memref<1x4x8x32xbf16, #tpu.memory_space<vmem>>, vector<1x4x8x32xbf16>
    %1 = vector.shape_cast %0 : vector<1x4x8x32xbf16> to vector<4x8x32xbf16>
    %c0_3 = arith.constant 0 : index
    %c0_4 = arith.constant 0 : index
    %c0_5 = arith.constant 0 : index
    %c0_6 = arith.constant 0 : index
    %2 = vector.load %arg3[%c0_3, %c0_4, %c0_5, %c0_6] : memref<1x4x8x32xbf16, #tpu.memory_space<vmem>>, vector<1x4x8x32xbf16>
    %3 = vector.shape_cast %2 : vector<1x4x8x32xbf16> to vector<4x8x32xbf16>
    %c0_7 = arith.constant 0 : index
    %c0_8 = arith.constant 0 : index
    %c0_9 = arith.constant 0 : index
    %c0_10 = arith.constant 0 : index
    %4 = vector.load %arg4[%c0_7, %c0_8, %c0_9, %c0_10] : memref<1x4x8x32xbf16, #tpu.memory_space<vmem>>, vector<1x4x8x32xbf16>
    %5 = vector.shape_cast %4 : vector<1x4x8x32xbf16> to vector<4x8x32xbf16>
    "tpu.trace_start"() <{level = 10 : i32, message = "hqd,hkd->hqk"}> : () -> ()
    %cst = arith.constant dense<0.000000e+00> : vector<4x8x8xf32>
    %6 = tpu.matmul %1, %3, %cst {dimension_numbers = #tpu.dot_dimension_numbers<[2], [2], [1], [1], [0, 0, 0, 1, 1, 1], [0], [0]>} : vector<4x8x32xbf16>, vector<4x8x32xbf16>, vector<4x8x8xf32> -> vector<4x8x8xf32>
    "tpu.trace_stop"() : () -> ()
    %cst_11 = arith.constant 0.176776692 : f32
    %7 = vector.broadcast %cst_11 : f32 to vector<4x8x8xf32>
    %8 = arith.mulf %6, %7 : vector<4x8x8xf32>
    %c0_12 = arith.constant 0 : index
    %c0_13 = arith.constant 0 : index
    %c0_14 = arith.constant 0 : index
    %9 = vector.load %arg5[%c0_12, %c0_13, %c0_14] : memref<1x1x8xf32, #tpu.memory_space<vmem>>, vector<1x1x8xf32>
    %10 = vector.shape_cast %9 : vector<1x1x8xf32> to vector<1x8xf32>
    %11 = vector.shape_cast %10 : vector<1x8xf32> to vector<1x1x8xf32>
    %12 = vector.broadcast %11 : vector<1x1x8xf32> to vector<4x8x8xf32>
    %13 = arith.addf %8, %12 : vector<4x8x8xf32>
    %cst_15 = arith.constant dense<0xFF800000> : vector<4x8xf32>
    %14 = vector.multi_reduction <maximumf>, %13, %cst_15 [2] : vector<4x8x8xf32> to vector<4x8xf32>
    %15 = vector.shape_cast %14 : vector<4x8xf32> to vector<4x8x1xf32>
    %16 = vector.broadcast %15 : vector<4x8x1xf32> to vector<4x8x8xf32>
    %17 = arith.subf %13, %16 : vector<4x8x8xf32>
    %18 = math.exp %17 : vector<4x8x8xf32>
    %cst_16 = arith.constant dense<0.000000e+00> : vector<4x8xf32>
    %19 = vector.multi_reduction <add>, %18, %cst_16 [2] : vector<4x8x8xf32> to vector<4x8xf32>
    %20 = vector.shape_cast %19 : vector<4x8xf32> to vector<4x8x1xf32>
    %21 = tpu.reciprocal %20 {approx = true} : vector<4x8x1xf32> -> vector<4x8x1xf32>
    %22 = vector.broadcast %21 : vector<4x8x1xf32> to vector<4x8x8xf32>
    %23 = arith.mulf %18, %22 : vector<4x8x8xf32>
    %24 = arith.truncf %23 : vector<4x8x8xf32> to vector<4x8x8xbf16>
    "tpu.trace_start"() <{level = 10 : i32, message = "hqk,hkd->hqd"}> : () -> ()
    %cst_17 = arith.constant dense<0.000000e+00> : vector<4x8x32xf32>
    %25 = tpu.matmul %24, %5, %cst_17 {dimension_numbers = #tpu.dot_dimension_numbers<[2], [1], [1], [2], [0, 0, 0, 1, 1, 2], [0], [0]>} : vector<4x8x8xbf16>, vector<4x8x32xbf16>, vector<4x8x32xf32> -> vector<4x8x32xf32>
    "tpu.trace_stop"() : () -> ()
    %26 = arith.truncf %25 : vector<4x8x32xf32> to vector<4x8x32xbf16>
    %c0_18 = arith.constant 0 : index
    %c0_19 = arith.constant 0 : index
    %c0_20 = arith.constant 0 : index
    %c0_21 = arith.constant 0 : index
    %27 = vector.load %arg6[%c0_18, %c0_19, %c0_20, %c0_21] : memref<1x4x8x32xbf16, #tpu.memory_space<vmem>>, vector<1x4x8x32xbf16>
    %28 = vector.shape_cast %27 : vector<1x4x8x32xbf16> to vector<4x8x32xbf16>
    %29 = vector.shape_cast %26 : vector<4x8x32xbf16> to vector<1x4x8x32xbf16>
    tpu.vector_store %arg6[%c0_18, %c0_19, %c0_20, %c0_21], %29 {strides = array<i32>} : memref<1x4x8x32xbf16, #tpu.memory_space<vmem>>, vector<1x4x8x32xbf16>,
    return
  }
  func.func @transform_0(%arg0: i32, %arg1: i32) -> (i32, i32, i32, i32) {
    %c0_i32 = arith.constant 0 : i32
    %c0_i32_0 = arith.constant 0 : i32
    %c0_i32_1 = arith.constant 0 : i32
    return %arg0, %c0_i32, %arg1, %c0_i32_0 : i32, i32, i32, i32
  }
  func.func @transform_1(%arg0: i32, %arg1: i32) -> (i32, i32, i32, i32) {
    %c0_i32 = arith.constant 0 : i32
    %c0_i32_0 = arith.constant 0 : i32
    %c0_i32_1 = arith.constant 0 : i32
    %c0_i32_2 = arith.constant 0 : i32
    return %arg0, %c0_i32, %c0_i32_0, %c0_i32_1 : i32, i32, i32, i32
  }
  func.func @transform_2(%arg0: i32, %arg1: i32) -> (i32, i32, i32, i32) {
    %c0_i32 = arith.constant 0 : i32
    %c0_i32_0 = arith.constant 0 : i32
    %c0_i32_1 = arith.constant 0 : i32
    %c0_i32_2 = arith.constant 0 : i32
    return %arg0, %c0_i32, %c0_i32_0, %c0_i32_1 : i32, i32, i32, i32
  }
  func.func @transform_3(%arg0: i32, %arg1: i32) -> (i32, i32, i32) {
    %c0_i32 = arith.constant 0 : i32
    %c0_i32_0 = arith.constant 0 : i32
    %c0_i32_1 = arith.constant 0 : i32
    return %arg0, %c0_i32, %c0_i32_0 : i32, i32, i32
  }
  func.func @transform_4(%arg0: i32, %arg1: i32) -> (i32, i32, i32, i32) {
    %c0_i32 = arith.constant 0 : i32
    %c0_i32_0 = arith.constant 0 : i32
    %c0_i32_1 = arith.constant 0 : i32
    return %arg0, %c0_i32, %arg1, %c0_i32_0 : i32, i32, i32, i32
  }
}

module attributes {stable_mosaic.version = 11 : i64} {
  func.func @_matmul_kernel(%arg0: i32, %arg1: i32, %arg2: i32, %arg3: memref<16x128xf32, #tpu.memory_space<vmem>>, %arg4: memref<128x256xbf16, #tpu.memory_space<vmem>>, %arg5: memref<1x256xf32, #tpu.memory_space<vmem>>, %arg6: memref<16x256xf32, #tpu.memory_space<vmem>>, %arg7: memref<16x256xf32, #tpu.memory_space<vmem>>) attributes {dimension_semantics = [#tpu.dimension_semantics<parallel>, #tpu.dimension_semantics<parallel>, #tpu.dimension_semantics<arbitrary>], iteration_bounds = array<i64: 1, 1, 1>, scalar_prefetch = 0 : i64, scratch_operands = 1 : i64, tpu.core_type = #tpu.core_type<tc>, window_params = [{transform_indices = @transform_0, window_bounds = array<i64: 16, 128>}, {transform_indices = @transform_1, window_bounds = array<i64: 128, 256>}, {transform_indices = @transform_2, window_bounds = array<i64: 1, 256>}, {transform_indices = @transform_3, window_bounds = array<i64: 16, 256>}]} {
    %c0_i32 = arith.constant 0 : i32
    %0 = arith.cmpi eq, %arg2, %c0_i32 : i32
    %1 = arith.extui %0 : i1 to i32
    %c0_i32_0 = arith.constant 0 : i32
    %2 = arith.cmpi ne, %1, %c0_i32_0 : i32
    scf.if %2 {
      %cst_10 = arith.constant 0.000000e+00 : f32
      %13 = vector.broadcast %cst_10 : f32 to vector<16x256xf32>
      %c0_11 = arith.constant 0 : index
      %c0_12 = arith.constant 0 : index
      %14 = vector.load %arg7[%c0_11, %c0_12] : memref<16x256xf32, #tpu.memory_space<vmem>>, vector<16x256xf32>
      tpu.vector_store %arg7[%c0_11, %c0_12], %13 {strides = array<i32>} : memref<16x256xf32, #tpu.memory_space<vmem>>, vector<16x256xf32>,
    } else {
    }
    %c0 = arith.constant 0 : index
    %c0_1 = arith.constant 0 : index
    %3 = vector.load %arg7[%c0, %c0_1] : memref<16x256xf32, #tpu.memory_space<vmem>>, vector<16x256xf32>
    %c0_2 = arith.constant 0 : index
    %c0_3 = arith.constant 0 : index
    %4 = vector.load %arg3[%c0_2, %c0_3] : memref<16x128xf32, #tpu.memory_space<vmem>>, vector<16x128xf32>
    %5 = arith.truncf %4 : vector<16x128xf32> to vector<16x128xbf16>
    %c0_4 = arith.constant 0 : index
    %c0_5 = arith.constant 0 : index
    %6 = vector.load %arg4[%c0_4, %c0_5] : memref<128x256xbf16, #tpu.memory_space<vmem>>, vector<128x256xbf16>
    %cst = arith.constant dense<0.000000e+00> : vector<16x256xf32>
    %7 = tpu.matmul %5, %6, %cst {dimension_numbers = #tpu.dot_dimension_numbers<[1], [0], [0], [1], [0, 0, 1, 1], [], []>} : vector<16x128xbf16>, vector<128x256xbf16>, vector<16x256xf32> -> vector<16x256xf32>
    %8 = arith.addf %3, %7 : vector<16x256xf32>
    %c0_6 = arith.constant 0 : index
    %c0_7 = arith.constant 0 : index
    %9 = vector.load %arg7[%c0_6, %c0_7] : memref<16x256xf32, #tpu.memory_space<vmem>>, vector<16x256xf32>
    tpu.vector_store %arg7[%c0_6, %c0_7], %8 {strides = array<i32>} : memref<16x256xf32, #tpu.memory_space<vmem>>, vector<16x256xf32>,
    %c0_i32_8 = arith.constant 0 : i32
    %10 = arith.cmpi eq, %arg2, %c0_i32_8 : i32
    %11 = arith.extui %10 : i1 to i32
    %c0_i32_9 = arith.constant 0 : i32
    %12 = arith.cmpi ne, %11, %c0_i32_9 : i32
    scf.if %12 {
      %c0_10 = arith.constant 0 : index
      %c0_11 = arith.constant 0 : index
      %13 = vector.load %arg7[%c0_10, %c0_11] : memref<16x256xf32, #tpu.memory_space<vmem>>, vector<16x256xf32>
      %c0_12 = arith.constant 0 : index
      %c0_13 = arith.constant 0 : index
      %14 = vector.load %arg5[%c0_12, %c0_13] : memref<1x256xf32, #tpu.memory_space<vmem>>, vector<1x256xf32>
      %15 = vector.broadcast %14 : vector<1x256xf32> to vector<16x256xf32>
      %16 = arith.addf %13, %15 : vector<16x256xf32>
      %c0_14 = arith.constant 0 : index
      %c0_15 = arith.constant 0 : index
      %17 = vector.load %arg6[%c0_14, %c0_15] : memref<16x256xf32, #tpu.memory_space<vmem>>, vector<16x256xf32>
      tpu.vector_store %arg6[%c0_14, %c0_15], %16 {strides = array<i32>} : memref<16x256xf32, #tpu.memory_space<vmem>>, vector<16x256xf32>,
    } else {
    }
    return
  }
  func.func @transform_0(%arg0: i32, %arg1: i32, %arg2: i32) -> (i32, i32) {
    %c0_i32 = arith.constant 0 : i32
    return %arg0, %arg2 : i32, i32
  }
  func.func @transform_1(%arg0: i32, %arg1: i32, %arg2: i32) -> (i32, i32) {
    %c0_i32 = arith.constant 0 : i32
    return %arg2, %arg1 : i32, i32
  }
  func.func @transform_2(%arg0: i32, %arg1: i32, %arg2: i32) -> (i32, i32) {
    %c0_i32 = arith.constant 0 : i32
    %c0_i32_0 = arith.constant 0 : i32
    return %c0_i32, %arg1 : i32, i32
  }
  func.func @transform_3(%arg0: i32, %arg1: i32, %arg2: i32) -> (i32, i32) {
    %c0_i32 = arith.constant 0 : i32
    return %arg0, %arg1 : i32, i32
  }
}

</mosaic_0001>

<bundles_post_ra>
// kernel: bart_lm_forward.36
= control target key start
LH: loop header
LB: loop body
LE: loop exit
PB: predicated region body
PF: predicated region fallthrough
CT: control target
= control target key end

     0   :  { %s107_s0 = inlined_call_operand.vmem [shape: f32[16,128], index: 0, kind: input, shape index: {}]   ;;  %s108_s1 = inlined_call_operand.vmem [shape: f32[1,128], index: 1, kind: input, shape index: {}]   ;;  %s109_s2 = inlined_call_operand.vmem [shape: f32[1,128], index: 2, kind: input, shape index: {}]   ;;  %s110_s3 = inlined_call_operand.vmem [shape: f32[16,128], index: 3, kind: output, shape index: {}]  }
   0x1   :  { %v14_v0 = vld [vmem:[%s107_s0] sm:$0xff]  ;;  %v15_v1 = vld [vmem:[%s107_s0 + $0x8] sm:$0xff] }
   0x2   :  { %16 = vadd.xlane.f32.xlu0 %v14_v0  ;;  %v63_v17 = vld [vmem:[%s108_s1] ss:$0 sm:$0xff] }
   0x3   :  { %v64_v19 = vld [vmem:[%s109_s2] ss:$0 sm:$0xff] }
   0x6   :  { %18 = vadd.xlane.f32.xlu0 %v15_v1 }
  0x8b   :  { %v17_v2 = vpop.xlane.xlu0 %16 }
  0x8c   :  { %v21_v3 = vmul.f32 0.0078125, %v17_v2 }
  0x8e   :  { %v23_v4 = vsub.f32 %v14_v0, %v21_v3 }
  0x8f   :  { %v19_v5 = vpop.xlane.xlu0 %18 }
  0x90   :  { %v22_v6 = vmul.f32 0.0078125, %v19_v5  ;;  %v25_v7 = vmul.f32 %v23_v4, %v23_v4 }
  0x92   :  { %v24_v8 = vsub.f32 %v15_v1, %v22_v6  ;;  %27 = vadd.xlane.f32.xlu1 %v25_v7 }
  0x94   :  { %v26_v9 = vmul.f32 %v24_v8, %v24_v8 }
  0x96   :  { %29 = vadd.xlane.f32.xlu1 %v26_v9 }
 0x11b   :  { %v28_v10 = vpop.xlane.xlu1 %27 }
 0x11c   :  { %v31_v11 = vmul.f32 0.0078125, %v28_v10 }
 0x11e   :  { %v33_v12 = vadd.f32 1e-05, %v31_v11 }
 0x11f   :  { %v30_v13 = vpop.xlane.xlu1 %29 }
 0x120   :  { %65 = vrsqrt.f32 %v33_v12  ;;  %v32_v14 = vmul.f32 0.0078125, %v30_v13 }
 0x122   :  { %v34_v15 = vadd.f32 1e-05, %v32_v14 }
 0x124   :  { %67 = vrsqrt.f32 %v34_v15 }
 0x12d   :  { %v66_v16 = vpop.eup %65 }
 0x12e   :  { %v37_v18 = vmul.f32 %v66_v16, %v23_v4 }
 0x130   :  { %v46_v20 = vmul.f32 %v63_v17, %v37_v18 }
 0x131   :  { %v68_v21 = vpop.eup %67 }
 0x132   :  { %v55_v22 = vadd.f32 %v64_v19, %v46_v20  ;;  %v38_v23 = vmul.f32 %v68_v21, %v24_v8 }
 0x134   :  { %57 = vst [vmem:[%s110_s3] sm:$0xff] %v55_v22  ;;  %v47_v24 = vmul.f32 %v63_v17, %v38_v23 }
 0x136   :  { %v56_v25 = vadd.f32 %v64_v19, %v47_v24 }
 0x138   :  { %58 = vst [vmem:[%s110_s3 + $0x8] sm:$0xff] %v56_v25 }

// kernel: bart_lm_forward.37
= control target key start
LH: loop header
LB: loop body
LE: loop exit
PB: predicated region body
PF: predicated region fallthrough
CT: control target
= control target key end

     0   :  { %v446_v0 = vmov 0.0   ;;  %vm447_vm0 = vmmov 0   ;;  %v448_v3 = vmov 0   ;;  %v301_v29 = vlaneseq  ;;  %s562_s1 = inlined_call_operand.vmem [shape: bf16[128,384], index: 1, kind: input, shape index: {}]   ;;  %s563_s0 = inlined_call_operand.vmem [shape: f32[16,128], index: 0, kind: input, shape index: {}]   ;;  %s564_s2 = inlined_call_operand.vmem [shape: f32[1,384], index: 2, kind: input, shape index: {}]   ;;  %s565_s3 = inlined_call_operand.vmem [shape: bf16[16,384], index: 3, kind: output, shape index: {}]  }
   0x1   :  { %391 = vmatprep.subr.bf16.mxu1 %v446_v0  ;;  %v414_v1 = vld [vmem:[%s562_s1 + $0xac] ss:$12 sps:$4 sm:$0xff]   ;;  %407 = vmatprep.mubr.msk.bf16.mxu1 %vm447_vm0, %v446_v0  ;;  %v416_v2 = vld [vmem:[%s562_s1 + $0xb0] ss:$12 sps:$4 sm:$0xff]   ;;  %v417_v4 = vld [vmem:[%s562_s1 + $0xa8] ss:$12 sps:$4 sm:$0xff]  }
   0x2   :  { %226 = vmatprep.mubr.bf16.mxu0 %v448_v3  ;;  %194 = vmatprep.subr.bf16.mxu0 %v414_v1  ;;  %v418_v5 = vld [vmem:[%s562_s1 + $0x94] ss:$12 sps:$4 sm:$0xff]   ;;  %v420_v6 = vld [vmem:[%s562_s1 + $0x98] ss:$12 sps:$4 sm:$0xff]   ;;  %v421_v7 = vld [vmem:[%s562_s1 + $0x90] ss:$12 sps:$4 sm:$0xff]  }
   0x3   :  { %392 = vmatpush3.bf16.msra.mxu1 %v416_v2  ;;  %195 = vmatpush1.bf16.msra.mxu0 %v417_v4  ;;  %v422_v8 = vld [vmem:[%s562_s1 + $0x7c] ss:$12 sps:$4 sm:$0xff]   ;;  %v424_v9 = vld [vmem:[%s562_s1 + $0x80] ss:$12 sps:$4 sm:$0xff]   ;;  %v425_v10 = vld [vmem:[%s562_s1 + $0x78] ss:$12 sps:$4 sm:$0xff]  }
   0x4   :  { %393 = vmatprep.subr.bf16.mxu1 %v446_v0  ;;  %196 = vmatprep.subr.bf16.mxu0 %v418_v5  ;;  %v426_v11 = vld [vmem:[%s562_s1 + $0x64] ss:$12 sps:$4 sm:$0xff]   ;;  %v428_v12 = vld [vmem:[%s562_s1 + $0x68] ss:$12 sps:$4 sm:$0xff]   ;;  %v429_v13 = vld [vmem:[%s562_s1 + $0x60] ss:$12 sps:$4 sm:$0xff]  }
   0x5   :  { %v430_v14 = vld [vmem:[%s562_s1 + $0x4c] ss:$12 sps:$4 sm:$0xff]   ;;  %v432_v15 = vld [vmem:[%s562_s1 + $0x50] ss:$12 sps:$4 sm:$0xff]   ;;  %v433_v16 = vld [vmem:[%s562_s1 + $0x48] ss:$12 sps:$4 sm:$0xff]  }
   0x6   :  { %v434_v17 = vld [vmem:[%s562_s1 + $0x34] ss:$12 sps:$4 sm:$0xff]   ;;  %v436_v18 = vld [vmem:[%s562_s1 + $0x38] ss:$12 sps:$4 sm:$0xff]   ;;  %v437_v19 = vld [vmem:[%s562_s1 + $0x30] ss:$12 sps:$4 sm:$0xff]  }
   0x7   :  { %394 = vmatpush3.bf16.msra.mxu1 %v420_v6  ;;  %197 = vmatpush1.bf16.msra.mxu0 %v421_v7  ;;  %v438_v20 = vld [vmem:[%s562_s1 + $0x1c] ss:$12 sps:$4 sm:$0xff]   ;;  %v440_v21 = vld [vmem:[%s562_s1 + $0x20] ss:$12 sps:$4 sm:$0xff]   ;;  %v441_v22 = vld [vmem:[%s562_s1 + $0x18] ss:$12 sps:$4 sm:$0xff]  }
   0x8   :  { %395 = vmatprep.subr.bf16.mxu1 %v446_v0  ;;  %198 = vmatprep.subr.bf16.mxu0 %v422_v8  ;;  %v442_v23 = vld [vmem:[%s562_s1 + $0x4] ss:$12 sps:$4 sm:$0xff]   ;;  %v444_v24 = vld [vmem:[%s562_s1 + $0x8] ss:$12 sps:$4 sm:$0xff]   ;;  %v445_v27 = vld [vmem:[%s562_s1] ss:$12 sps:$4 sm:$0xff]  }
   0x9   :  { %v31_v25 = vld [vmem:[%s563_s0] sm:$0xff]  ;;  %v32_v26 = vld [vmem:[%s563_s0 + $0x8] sm:$0xff]  ;;  %v302_v30 = vshrl.u32 %v301_v29, 7 }
   0xa   :  { %v33_v28 = vpack.c.bf16 %v32_v26, %v31_v25  ;;  %v299_v32 = vld [vmem:[%s564_s2] sm:$0x7] }
   0xb   :  { %396 = vmatpush3.bf16.msra.mxu1 %v424_v9  ;;  %199 = vmatpush1.bf16.msra.mxu0 %v425_v10  ;;  %v311_v31 = vsub.s32 2, %v302_v30  ;;  %v303_v33 = vsub.s32 0, %v302_v30  ;;  %v307_v34 = vsub.s32 1, %v302_v30 }
   0xc   :  { %397 = vmatprep.subr.bf16.mxu1 %v446_v0  ;;  %200 = vmatprep.subr.bf16.mxu0 %v426_v11 }
   0xd   :  { %v312_v35 = vrot.slane %v299_v32, %v311_v31  ;;  %v304_v37 = vrot.slane %v299_v32, %v303_v33  ;;  %v308_v38 = vrot.slane %v299_v32, %v307_v34 }
   0xf   :  { %398 = vmatpush3.bf16.msra.mxu1 %v428_v12  ;;  %201 = vmatpush1.bf16.msra.mxu0 %v429_v13 }
  0x10   :  { %399 = vmatprep.subr.bf16.mxu1 %v446_v0  ;;  %202 = vmatprep.subr.bf16.mxu0 %v430_v14 }
  0x13   :  { %400 = vmatpush3.bf16.msra.mxu1 %v432_v15  ;;  %203 = vmatpush1.bf16.msra.mxu0 %v433_v16 }
  0x14   :  { %401 = vmatprep.subr.bf16.mxu1 %v446_v0  ;;  %204 = vmatprep.subr.bf16.mxu0 %v434_v17 }
  0x17   :  { %402 = vmatpush3.bf16.msra.mxu1 %v436_v18  ;;  %205 = vmatpush1.bf16.msra.mxu0 %v437_v19 }
  0x18   :  { %403 = vmatprep.subr.bf16.mxu1 %v446_v0  ;;  %206 = vmatprep.subr.bf16.mxu0 %v438_v20 }
  0x1b   :  { %404 = vmatpush3.bf16.msra.mxu1 %v440_v21  ;;  %207 = vmatpush1.bf16.msra.mxu0 %v441_v22 }
  0x1c   :  { %405 = vmatprep.subr.bf16.mxu1 %v446_v0  ;;  %208 = vmatprep.subr.bf16.mxu0 %v442_v23 }
  0x1f   :  { %406 = vmatpush3.bf16.msra.mxu1 %v444_v24  ;;  %209 = vmatpush1.bf16.msra.mxu0 %v445_v27 }
  0x22   :  { %408 = vmatmul.mubr.bf16.vlgmr.msra.gmra.mxu1 %v33_v28  ;;  %227 = vmatmul.mubr.bf16.vlgmr.msra.gmra.mxu0 %v33_v28 }
  0xe2   :  { %v271_v36 = vpop.f32.mrf.mxu1  ;;  %v228_v40 = vpop.f32.mrf.mxu0 }
  0xe3   :  { %v318_v39 = vadd.f32 %v312_v35, %v271_v36  ;;  %v316_v44 = vadd.f32 %v304_v37, %v228_v40 }
  0xe4   :  { %v409_v41 = vpop.f32.mrf.mxu1  ;;  %v230_v43 = vpop.f32.mrf.mxu0 }
  0xe5   :  { %v379_v42 = vpack.c.bf16 %v318_v39, %v318_v39  ;;  %v317_v45 = vadd.f32 %v308_v38, %v230_v43 }
  0xe6   :  { %v274_v46 = vpop.f32.mrf.mxu1  ;;  %v232_v48 = vpop.f32.mrf.mxu0 }
  0xe7   :  { %343 = vst [vmem:[%s565_s3 + $0x8] sm:$0xf] %v379_v42  ;;  %v321_v47 = vadd.f32 %v312_v35, %v274_v46  ;;  %v378_v49 = vpack.c.bf16 %v317_v45, %v316_v44  ;;  %v319_v53 = vadd.f32 %v304_v37, %v232_v48 }
  0xe8   :  { %v410_v50 = vpop.f32.mrf.mxu1  ;;  %v234_v52 = vpop.f32.mrf.mxu0 }
  0xe9   :  { %v381_v51 = vpack.c.bf16 %v321_v47, %v321_v47  ;;  %342 = vst [vmem:[%s565_s3] sm:$0xff] %v378_v49  ;;  %v320_v54 = vadd.f32 %v308_v38, %v234_v52 }
  0xeb   :  { %345 = vst [vmem:[%s565_s3 + $0x14] sm:$0xf] %v381_v51  ;;  %v380_v55 = vpack.c.bf16 %v320_v54, %v319_v53 }
  0xed   :  { %344 = vst [vmem:[%s565_s3 + $0xc] sm:$0xff] %v380_v55 }

// kernel: bart_lm_forward.38
= control target key start
LH: loop header
LB: loop body
LE: loop exit
PB: predicated region body
PF: predicated region fallthrough
CT: control target
= control target key end

     0   :  { %s1054_s15 = smov 0   ;;  %s1056_s16 = smov 0   ;;  %s1158_s0 = inlined_call_operand.vmem [shape: bf16[2,4,8,32], index: 0, kind: input, shape index: {}]   ;;  %s1159_s1 = inlined_call_operand.vmem [shape: bf16[2,4,8,32], index: 1, kind: input, shape index: {}]   ;;  %s1160_s2 = inlined_call_operand.vmem [shape: bf16[2,4,8,32], index: 2, kind: input, shape index: {}]   ;;  %s1161_s3 = inlined_call_operand.vmem [shape: f32[2,1,8], index: 3, kind: input, shape index: {}]   ;;  %s1162_s4 = inlined_call_operand.vmem [shape: bf16[2,4,8,32], index: 4, kind: output, shape index: {}]  }
   0x1   :  { %s1058_s17 = smov 0  }
   0x2 LB: > { %s26_s18 = sadd.s32 1, %s1021_s16  ;;  %p873_p0 = scmp.ge.s32.totalorder %s1025_s17, 1  ;;  %s1025_s17 = sphi %s1058_s17, %s14_s17   ;;  %s1021_s16 = sphi %s1056_s16, %s1164_s16   ;;  %s1017_s15 = sphi %s1054_s15, %s1163_s15  }
   0x3   : > { %p28_p1 = scmp.ge.s32.totalorder %s26_s18, 2  ;;  %p209_p2 = scmp.lt.s32.totalorder %s1025_s17, 3 }
   0x5   : > { %s1166_s18 = smov (%p28_p1, %s26_s18), 0  ;;  %p210_p3 = pnand %p873_p0, %p209_p2 }
   0x6   : > { %p254_p4 = scmp.lt.s32.totalorder (!%p210_p3), %s1017_s15, 1 }
   0x7   : > { %213 = sbr.rel (%p210_p3) target bundleno = 747 (0x2eb), region = 36 }
   0xc   : > { %v1027_v0 = vmov 0.0   ;;  %s1168_s15 = smov (!%p254_p4, %s1017_s15), 1  ;;  %vm1028_vm0 = vmmov 0   ;;  %vm296_vm1 = vcmask 261120   ;;  %v497_v13 = vlaneseq }
   0xd   : > { %913 = vmatprep.subr.bf16.mxu0 %v1027_v0  ;;  %919 = vmatprep.subr.bf16.mxu1 %v1027_v0  ;;  %s1081_s19 = sshll.u32 %s1168_s15, 4  ;;  %s274_s28 = scalar_lea.vmem %s1161_s3, %s1168_s15  ;;  %vm510_vm3 = vcmask 64512   ;;  %vm562_vm4 = vcmask 1043456   ;;  %vm748_vm5 = vcmask 257024  }
   0xe   : > { %915 = vmatprep.mubr.msk.bf16.mxu0 %vm1028_vm0, %v1027_v0  ;;  %921 = vmatprep.mubr.msk.bf16.mxu1 %vm1028_vm0, %v1027_v0  ;;  %s266_s22 = scalar_lea.vmem %s1159_s1, %s1081_s19  ;;  %s261_s25 = scalar_lea.vmem %s1158_s0, %s1081_s19  ;;  %v498_v14 = vshrl.u32 %v497_v13, 7  ;;  %v502_v15 = vand.u32 127, %v497_v13  ;;  %v886_v17 = vld [vmem:[%s274_s28] ss:$0 sm:$0xff] }
   0xf   : > { %v288_v1 = vld [vmem:[%s266_s22] sm:$0xf]  ;;  %v289_v2 = vld [vmem:[%s266_s22 + $0x4] sm:$0xf]  ;;  %v290_v5 = vld [vmem:[%s266_s22 + $0x8] sm:$0xf]  ;;  %s271_s5 = scalar_lea.vmem %s1160_s2, %s1081_s19  ;;  %s282_s8 = scalar_lea.vmem %s1162_s4, %s1081_s19 }
  0x10   : > { %v301_v3 = vsel %vm296_vm1, %v288_v1, 0  ;;  %v347_v4 = vsel %vm296_vm1, %v289_v2, 0  ;;  %v291_v6 = vld [vmem:[%s266_s22 + $0xc] sm:$0xf]  ;;  %v284_v7 = vld [vmem:[%s261_s25] sm:$0xf]  ;;  %vm503_vm2 = vcmp.gt.s32.totalorder %v502_v15, %v498_v14 }
  0x11   : > { %914 = vmatpush3.bf16.xpose.msra.mxu0 %v301_v3  ;;  %920 = vmatpush3.bf16.xpose.msra.mxu1 %v347_v4  ;;  %v285_v8 = vld [vmem:[%s261_s25 + $0x4] sm:$0xf]  ;;  %v393_v9 = vsel %vm296_vm1, %v290_v5, 0  ;;  %v439_v10 = vsel %vm296_vm1, %v291_v6, 0  ;;  %v286_v11 = vld [vmem:[%s261_s25 + $0x8] sm:$0xf] }
  0x12   : > { %925 = vmatprep.subr.bf16.mxu0 %v1027_v0  ;;  %931 = vmatprep.subr.bf16.mxu1 %v1027_v0  ;;  %v287_v12 = vld [vmem:[%s261_s25 + $0xc] sm:$0xf]  ;;  %v292_v6 = vld [vmem:[%s271_s5] sm:$0xf] }
  0x18   : > { %916 = vmatmul.mubr.msk.bf16.vlgmr.msra.gmra.mxu0 %vm296_vm1, %v284_v7  ;;  %922 = vmatmul.mubr.msk.bf16.vlgmr.msra.gmra.mxu1 %vm296_vm1, %v285_v8  ;;  %v293_v7 = vld [vmem:[%s271_s5 + $0x4] sm:$0xf]  ;;  %v564_v8 = vsel %vm562_vm4, %v292_v6, 0 }
  0x19   : > { %926 = vmatpush3.bf16.xpose.msra.mxu0 %v393_v9  ;;  %932 = vmatpush3.bf16.xpose.msra.mxu1 %v439_v10  ;;  %v610_v9 = vsel %vm562_vm4, %v293_v7, 0  ;;  %v294_v10 = vld [vmem:[%s271_s5 + $0x8] sm:$0xf] }
  0x1a   : > { %927 = vmatprep.mubr.msk.bf16.mxu0 %vm1028_vm0, %v1027_v0  ;;  %933 = vmatprep.mubr.msk.bf16.mxu1 %vm1028_vm0, %v1027_v0 }
  0x1b   : > { %937 = vmatprep.subr.bf16.mxu0 %v1027_v0  ;;  %943 = vmatprep.subr.bf16.mxu1 %v1027_v0 }
  0x20   : > { %928 = vmatmul.mubr.msk.bf16.vlgmr.msra.gmra.mxu0 %vm296_vm1, %v286_v11  ;;  %934 = vmatmul.mubr.msk.bf16.vlgmr.msra.gmra.mxu1 %vm296_vm1, %v287_v12  ;;  %v656_v11 = vsel %vm562_vm4, %v294_v10, 0  ;;  %v295_v12 = vld [vmem:[%s271_s5 + $0xc] sm:$0xf] }
  0x21   : > { %939 = vmatprep.mubr.msk.bf16.mxu0 %vm1028_vm0, %v1027_v0  ;;  %945 = vmatprep.mubr.msk.bf16.mxu1 %vm1028_vm0, %v1027_v0  ;;  %v702_v13 = vsel %vm562_vm4, %v295_v12, 0 }
  0x22   : > { %938 = vmatpush3.bf16.msra.mxu0 %v564_v8  ;;  %944 = vmatpush3.bf16.msra.mxu1 %v610_v9 }
  0x23   : > { %949 = vmatprep.subr.bf16.mxu0 %v1027_v0  ;;  %955 = vmatprep.subr.bf16.mxu1 %v1027_v0 }
  0xd8   : > { %v337_v16 = vpop.f32.mrf.mxu0  ;;  %v383_v18 = vpop.f32.mrf.mxu1 }
  0xd9   : > { %v481_v19 = vmul.f32 0.17677669, %v337_v16  ;;  %v482_v20 = vmul.f32 0.17677669, %v383_v18 }
  0xda   : > { %v917_v21 = vpop.f32.mrf.mxu0  ;;  %v923_v22 = vpop.f32.mrf.mxu1 }
  0xdb   : > { %v492_v23 = vadd.f32 %v886_v17, %v481_v19  ;;  %v493_v24 = vadd.f32 %v886_v17, %v482_v20 }
  0xdc   : > { %v340_v25 = vpop.f32.mrf.mxu0  ;;  %v386_v26 = vpop.f32.mrf.mxu1 }
  0xdd   : > { %v506_v27 = vsel %vm503_vm2, -1e+09, %v492_v23  ;;  %v507_v28 = vsel %vm503_vm2, -1e+09, %v493_v24 }
  0xde   : > { %v918_v29 = vpop.f32.mrf.mxu0  ;;  %v924_v30 = vpop.f32.mrf.mxu1  ;;  %v511_v31 = vsel %vm510_vm3, %v506_v27, -inf  ;;  %v514_v34 = vsel %vm510_vm3, %v507_v28, -inf }
  0xdf   : > { %512 = vmax.xlane.f32.xlu0 %v511_v31 }
  0xe0   : > { %v429_v32 = vpop.f32.mrf.mxu0  ;;  %v475_v33 = vpop.f32.mrf.mxu1 }
  0xe1   : > { %v483_v35 = vmul.f32 0.17677669, %v429_v32  ;;  %v484_v36 = vmul.f32 0.17677669, %v475_v33 }
  0xe2   : > { %v929_v37 = vpop.f32.mrf.mxu0  ;;  %v935_v38 = vpop.f32.mrf.mxu1 }
  0xe3   : > { %v494_v39 = vadd.f32 %v886_v17, %v483_v35  ;;  %v495_v40 = vadd.f32 %v886_v17, %v484_v36  ;;  %515 = vmax.xlane.f32.xlu0 %v514_v34 }
  0xe4   : > { %v432_v41 = vpop.f32.mrf.mxu0  ;;  %v478_v42 = vpop.f32.mrf.mxu1 }
  0xe5   : > { %v508_v43 = vsel %vm503_vm2, -1e+09, %v494_v39  ;;  %v509_v44 = vsel %vm503_vm2, -1e+09, %v495_v40 }
  0xe6   : > { %v930_v45 = vpop.f32.mrf.mxu0  ;;  %v936_v46 = vpop.f32.mrf.mxu1  ;;  %v517_v47 = vsel %vm510_vm3, %v508_v43, -inf  ;;  %v520_v48 = vsel %vm510_vm3, %v509_v44, -inf }
  0xe7   : > { %518 = vmax.xlane.f32.xlu1 %v517_v47 }
  0xeb   : > { %521 = vmax.xlane.f32.xlu1 %v520_v48 }
 0x168   : > { %v513_v49 = vpop.xlane.xlu0 %512 }
 0x169   : > { %v523_v50 = vsub.f32 %v506_v27, %v513_v49 }
 0x16b   : > { %v527_v51 = vmul.f32 1.442695, %v523_v50 }
 0x16c   : > { %v516_v52 = vpop.xlane.xlu0 %515 }
 0x16d   : > { %987 = vpow2.f32 %v527_v51  ;;  %v524_v53 = vsub.f32 %v507_v28, %v516_v52 }
 0x16f   : > { %v529_v54 = vmul.f32 1.442695, %v524_v53 }
 0x170   : > { %v519_v55 = vpop.xlane.xlu1 %518 }
 0x171   : > { %989 = vpow2.f32 %v529_v54  ;;  %v525_v56 = vsub.f32 %v508_v43, %v519_v55 }
 0x173   : > { %v531_v57 = vmul.f32 1.442695, %v525_v56 }
 0x174   : > { %v522_v58 = vpop.xlane.xlu1 %521 }
 0x175   : > { %991 = vpow2.f32 %v531_v57  ;;  %v526_v59 = vsub.f32 %v509_v44, %v522_v58 }
 0x177   : > { %v533_v60 = vmul.f32 1.442695, %v526_v59 }
 0x179   : > { %993 = vpow2.f32 %v533_v60 }
 0x17a   : > { %v988_v61 = vpop.eup %987 }
 0x17b   : > { %v535_v62 = vsel %vm510_vm3, %v988_v61, 0.0 }
 0x17c   : > { %536 = vadd.xlane.f32.xlu0 %v535_v62 }
 0x17e   : > { %v990_v63 = vpop.eup %989 }
 0x17f   : > { %v538_v1 = vsel %vm510_vm3, %v990_v63, 0.0 }
 0x180   : > { %539 = vadd.xlane.f32.xlu1 %v538_v1 }
 0x182   : > { %v992_v2 = vpop.eup %991 }
 0x183   : > { %v541_v3 = vsel %vm510_vm3, %v992_v2, 0.0 }
 0x184   : > { %542 = vadd.xlane.f32.xlu0 %v541_v3 }
 0x186   : > { %v994_v4 = vpop.eup %993 }
 0x187   : > { %v544_v5 = vsel %vm510_vm3, %v994_v4, 0.0 }
 0x188   : > { %545 = vadd.xlane.f32.xlu1 %v544_v5 }
 0x205   : > { %v537_v14 = vpop.xlane.xlu0 %536 }
 0x206   : > { %995 = vrcp.f32 %v537_v14 }
 0x209   : > { %v540_v15 = vpop.xlane.xlu1 %539 }
 0x20a   : > { %997 = vrcp.f32 %v540_v15 }
 0x20d   : > { %v543_v16 = vpop.xlane.xlu0 %542 }
 0x20e   : > { %999 = vrcp.f32 %v543_v16 }
 0x211   : > { %v546_v17 = vpop.xlane.xlu1 %545 }
 0x212   : > { %1001 = vrcp.f32 %v546_v17 }
 0x213   : > { %v996_v18 = vpop.eup %995 }
 0x214   : > { %v551_v19 = vmul.f32 %v996_v18, %v988_v61 }
 0x216   : > { %v555_v20 = vpack.c.bf16 %v551_v19, %v551_v19 }
 0x217   : > { %v998_v21 = vpop.eup %997 }
 0x218   : > { %940 = vmatmul.mubr.msk.bf16.vlgmr.msra.gmra.mxu0 %vm510_vm3, %v555_v20  ;;  %v552_v22 = vmul.f32 %v998_v21, %v990_v63 }
 0x219   : > { %950 = vmatpush3.bf16.msra.mxu0 %v656_v11  ;;  %951 = vmatprep.mubr.msk.bf16.mxu0 %vm1028_vm0, %v1027_v0 }
 0x21a   : > { %v556_v23 = vpack.c.bf16 %v552_v22, %v552_v22 }
 0x21b   : > { %v1000_v24 = vpop.eup %999 }
 0x21c   : > { %946 = vmatmul.mubr.msk.bf16.vlgmr.msra.gmra.mxu1 %vm510_vm3, %v556_v23  ;;  %v553_v25 = vmul.f32 %v1000_v24, %v992_v2 }
 0x21d   : > { %956 = vmatpush3.bf16.msra.mxu1 %v702_v13  ;;  %957 = vmatprep.mubr.msk.bf16.mxu1 %vm1028_vm0, %v1027_v0 }
 0x21e   : > { %v557_v26 = vpack.c.bf16 %v553_v25, %v553_v25 }
 0x21f   : > { %v1002_v27 = vpop.eup %1001 }
 0x220   : > { %952 = vmatmul.mubr.msk.bf16.vlgmr.msra.gmra.mxu0 %vm510_vm3, %v557_v26  ;;  %v554_v28 = vmul.f32 %v1002_v27, %v994_v4 }
 0x222   : > { %v558_v29 = vpack.c.bf16 %v554_v28, %v554_v28 }
 0x224   : > { %958 = vmatmul.mubr.msk.bf16.vlgmr.msra.gmra.mxu1 %vm510_vm3, %v558_v29 }
 0x2d8   : > { %v600_v30 = vpop.f32.mrf.mxu0 }
 0x2d9   : > { %v744_v31 = vpack.c.bf16 %v600_v30, %v600_v30 }
 0x2da   : > { %v941_v32 = vpop.f32.mrf.mxu0 }
 0x2db   : > { %749 = vst.msk [vmem:[%s282_s8] sm:$0xf] %vm748_vm5, %v744_v31 }
 0x2dc   : > { %v603_v33 = vpop.f32.mrf.mxu0  ;;  %v646_v0 = vpop.f32.mrf.mxu1 }
 0x2dd   : > { %v745_v34 = vpack.c.bf16 %v646_v0, %v646_v0 }
 0x2de   : > { %v942_v35 = vpop.f32.mrf.mxu0  ;;  %v947_v36 = vpop.f32.mrf.mxu1 }
 0x2df   : > { %750 = vst.msk [vmem:[%s282_s8 + $0x4] sm:$0xf] %vm748_vm5, %v745_v34 }
 0x2e0   : > { %v649_v37 = vpop.f32.mrf.mxu1  ;;  %v692_v38 = vpop.f32.mrf.mxu0 }
 0x2e1   : > { %v746_v39 = vpack.c.bf16 %v692_v38, %v692_v38 }
 0x2e2   : > { %v948_v40 = vpop.f32.mrf.mxu1  ;;  %v953_v41 = vpop.f32.mrf.mxu0 }
 0x2e3   : > { %751 = vst.msk [vmem:[%s282_s8 + $0x8] sm:$0xf] %vm748_vm5, %v746_v39 }
 0x2e4   : > { %v695_v42 = vpop.f32.mrf.mxu0  ;;  %v738_v43 = vpop.f32.mrf.mxu1 }
 0x2e5   : > { %v747_v44 = vpack.c.bf16 %v738_v43, %v738_v43 }
 0x2e6   : > { %v954_v45 = vpop.f32.mrf.mxu0  ;;  %v959_v46 = vpop.f32.mrf.mxu1 }
 0x2e7   : > { %752 = vst.msk [vmem:[%s282_s8 + $0xc] sm:$0xf] %vm748_vm5, %v747_v44 }
 0x2e8   : > { %v741_v47 = vpop.f32.mrf.mxu1 }
 0x2ea   : > { %v960_v48 = vpop.f32.mrf.mxu1 }
 0x2eb PF: > { %s14_s17 = sadd.s32 1, %s1025_s17   ;;  %s1163_s15 = smov %s1021_s16 }
 0x2ec   : > { %p11_p5 = scmp.ge.s32.totalorder %s14_s17, 4   ;;  %s1164_s16 = smov %s1166_s18 }
 0x2ee   :  { %13 = sbr.rel (!%p11_p5) target bundleno = 2 (0x2), region = 75 }

// kernel: bart_lm_forward.40
= control target key start
LH: loop header
LB: loop body
LE: loop exit
PB: predicated region body
PF: predicated region fallthrough
CT: control target
= control target key end

     0   :  { %v220_v0 = vmov 0.0   ;;  %vm221_vm0 = vmmov 0   ;;  %s278_s1 = inlined_call_operand.vmem [shape: bf16[128,128], index: 1, kind: input, shape index: {}]   ;;  %s279_s0 = inlined_call_operand.vmem [shape: f32[16,128], index: 0, kind: input, shape index: {}]   ;;  %s280_s2 = inlined_call_operand.vmem [shape: f32[1,128], index: 2, kind: input, shape index: {}]   ;;  %s281_s3 = inlined_call_operand.vmem [shape: bf16[16,128], index: 3, kind: output, shape index: {}]  }
   0x1   :  { %190 = vmatprep.subr.bf16.mxu0 %v220_v0  ;;  %v212_v1 = vld [vmem:[%s278_s1 + $0x38] sm:$0xff]   ;;  %206 = vmatprep.mubr.msk.bf16.mxu0 %vm221_vm0, %v220_v0  ;;  %v213_v2 = vld [vmem:[%s278_s1 + $0x30] sm:$0xff]   ;;  %v214_v3 = vld [vmem:[%s278_s1 + $0x28] sm:$0xff]  }
   0x2   :  { %191 = vmatpush3.bf16.msra.mxu0 %v212_v1  ;;  %v215_v4 = vld [vmem:[%s278_s1 + $0x20] sm:$0xff]   ;;  %v216_v5 = vld [vmem:[%s278_s1 + $0x18] sm:$0xff]   ;;  %v217_v6 = vld [vmem:[%s278_s1 + $0x10] sm:$0xff]  }
   0x3   :  { %192 = vmatprep.subr.bf16.mxu0 %v220_v0  ;;  %v218_v7 = vld [vmem:[%s278_s1 + $0x8] sm:$0xff]   ;;  %v219_v8 = vld [vmem:[%s278_s1] sm:$0xff]  }
   0x4   :  { %v23_v9 = vld [vmem:[%s279_s0] sm:$0xff]  ;;  %v24_v10 = vld [vmem:[%s279_s0 + $0x8] sm:$0xff] }
   0x5   :  { %v25_v11 = vpack.c.bf16 %v24_v10, %v23_v9  ;;  %v171_v13 = vld [vmem:[%s280_s2] ss:$0 sm:$0xff] }
   0x6   :  { %193 = vmatpush3.bf16.msra.mxu0 %v213_v2 }
   0x7   :  { %194 = vmatprep.subr.bf16.mxu0 %v220_v0 }
   0xa   :  { %195 = vmatpush3.bf16.msra.mxu0 %v214_v3 }
   0xb   :  { %196 = vmatprep.subr.bf16.mxu0 %v220_v0 }
   0xe   :  { %197 = vmatpush3.bf16.msra.mxu0 %v215_v4 }
   0xf   :  { %198 = vmatprep.subr.bf16.mxu0 %v220_v0 }
  0x12   :  { %199 = vmatpush3.bf16.msra.mxu0 %v216_v5 }
  0x13   :  { %200 = vmatprep.subr.bf16.mxu0 %v220_v0 }
  0x16   :  { %201 = vmatpush3.bf16.msra.mxu0 %v217_v6 }
  0x17   :  { %202 = vmatprep.subr.bf16.mxu0 %v220_v0 }
  0x1a   :  { %203 = vmatpush3.bf16.msra.mxu0 %v218_v7 }
  0x1b   :  { %204 = vmatprep.subr.bf16.mxu0 %v220_v0 }
  0x1e   :  { %205 = vmatpush3.bf16.msra.mxu0 %v219_v8 }
  0x21   :  { %207 = vmatmul.mubr.bf16.vlgmr.msra.gmra.mxu0 %v25_v11 }
  0xe1   :  { %v124_v12 = vpop.f32.mrf.mxu0 }
  0xe2   :  { %v147_v16 = vadd.f32 %v171_v13, %v124_v12 }
  0xe3   :  { %v208_v14 = vpop.f32.mrf.mxu0 }
  0xe5   :  { %v127_v15 = vpop.f32.mrf.mxu0 }
  0xe6   :  { %v148_v17 = vadd.f32 %v171_v13, %v127_v15 }
  0xe7   :  { %v209_v18 = vpop.f32.mrf.mxu0 }
  0xe8   :  { %v179_v19 = vpack.c.bf16 %v148_v17, %v147_v16 }
  0xea   :  { %180 = vst [vmem:[%s281_s3] sm:$0xff] %v179_v19  }

// kernel: bart_lm_forward.39
= control target key start
LH: loop header
LB: loop body
LE: loop exit
PB: predicated region body
PF: predicated region fallthrough
CT: control target
= control target key end

     0   :  { %v251_v0 = vmov 0.0   ;;  %vm252_vm0 = vmmov 0   ;;  %s336_s1 = inlined_call_operand.vmem [shape: bf16[128,128], index: 1, kind: input, shape index: {}]   ;;  %s337_s0 = inlined_call_operand.vmem [shape: bf16[16,128], index: 0, kind: input, shape index: {}]   ;;  %s338_s2 = inlined_call_operand.vmem [shape: f32[1,128], index: 2, kind: input, shape index: {}]   ;;  %s339_s3 = inlined_call_operand.vmem [shape: f32[16,128], index: 3, kind: input, shape index: {}]   ;;  %s340_s4 = inlined_call_operand.vmem [shape: f32[1,128], index: 4, kind: input, shape index: {}]   ;;  %s341_s5 = inlined_call_operand.vmem [shape: f32[1,128], index: 5, kind: input, shape index: {}]   ;;  %s342_s6 = inlined_call_operand.vmem [shape: f32[16,128], index: 6, kind: output, shape index: {}]  }
   0x1   :  { %216 = vmatprep.subr.bf16.mxu0 %v251_v0  ;;  %v238_v1 = vld [vmem:[%s336_s1 + $0x38] sm:$0xff]   ;;  %232 = vmatprep.mubr.msk.bf16.mxu0 %vm252_vm0, %v251_v0  ;;  %v239_v2 = vld [vmem:[%s336_s1 + $0x30] sm:$0xff]   ;;  %v240_v3 = vld [vmem:[%s336_s1 + $0x28] sm:$0xff]  }
   0x2   :  { %217 = vmatpush3.bf16.msra.mxu0 %v238_v1  ;;  %v241_v4 = vld [vmem:[%s336_s1 + $0x20] sm:$0xff]   ;;  %v242_v5 = vld [vmem:[%s336_s1 + $0x18] sm:$0xff]   ;;  %v243_v6 = vld [vmem:[%s336_s1 + $0x10] sm:$0xff]  }
   0x3   :  { %218 = vmatprep.subr.bf16.mxu0 %v251_v0  ;;  %v244_v7 = vld [vmem:[%s336_s1 + $0x8] sm:$0xff]   ;;  %v245_v8 = vld [vmem:[%s336_s1] sm:$0xff]  }
   0x4   :  { %v246_v9 = vld [vmem:[%s337_s0] sm:$0xff]   ;;  %v145_v17 = vld [vmem:[%s339_s3 + $0x8] sm:$0xff] }
   0x5   :  { %v195_v10 = vld [vmem:[%s338_s2] ss:$0 sm:$0xff] }
   0x6   :  { %219 = vmatpush3.bf16.msra.mxu0 %v239_v2  ;;  %v144_v12 = vld [vmem:[%s339_s3] sm:$0xff] }
   0x7   :  { %220 = vmatprep.subr.bf16.mxu0 %v251_v0  ;;  %v205_v36 = vld [vmem:[%s340_s4] ss:$0 sm:$0xff] }
   0x8   :  { %v206_v38 = vld [vmem:[%s341_s5] ss:$0 sm:$0xff] }
   0xa   :  { %221 = vmatpush3.bf16.msra.mxu0 %v240_v3 }
   0xb   :  { %222 = vmatprep.subr.bf16.mxu0 %v251_v0 }
   0xe   :  { %223 = vmatpush3.bf16.msra.mxu0 %v241_v4 }
   0xf   :  { %224 = vmatprep.subr.bf16.mxu0 %v251_v0 }
  0x12   :  { %225 = vmatpush3.bf16.msra.mxu0 %v242_v5 }
  0x13   :  { %226 = vmatprep.subr.bf16.mxu0 %v251_v0 }
  0x16   :  { %227 = vmatpush3.bf16.msra.mxu0 %v243_v6 }
  0x17   :  { %228 = vmatprep.subr.bf16.mxu0 %v251_v0 }
  0x1a   :  { %229 = vmatpush3.bf16.msra.mxu0 %v244_v7 }
  0x1b   :  { %230 = vmatprep.subr.bf16.mxu0 %v251_v0 }
  0x1e   :  { %231 = vmatpush3.bf16.msra.mxu0 %v245_v8 }
  0x21   :  { %233 = vmatmul.mubr.bf16.vlgmr.msra.gmra.mxu0 %v246_v9 }
  0xe1   :  { %v137_v11 = vpop.f32.mrf.mxu0 }
  0xe2   :  { %v138_v13 = vadd.f32 %v195_v10, %v137_v11 }
  0xe3   :  { %v234_v14 = vpop.f32.mrf.mxu0 }
  0xe4   :  { %v146_v15 = vadd.f32 %v144_v12, %v138_v13 }
  0xe5   :  { %v140_v16 = vpop.f32.mrf.mxu0 }
  0xe6   :  { %v141_v18 = vadd.f32 %v195_v10, %v140_v16  ;;  %148 = vadd.xlane.f32.xlu0 %v146_v15 }
  0xe7   :  { %v235_v19 = vpop.f32.mrf.mxu0 }
  0xe8   :  { %v147_v20 = vadd.f32 %v145_v17, %v141_v18 }
  0xea   :  { %150 = vadd.xlane.f32.xlu0 %v147_v20 }
 0x16f   :  { %v149_v21 = vpop.xlane.xlu0 %148 }
 0x170   :  { %v153_v22 = vmul.f32 0.0078125, %v149_v21 }
 0x172   :  { %v155_v23 = vsub.f32 %v146_v15, %v153_v22 }
 0x173   :  { %v151_v24 = vpop.xlane.xlu0 %150 }
 0x174   :  { %v154_v25 = vmul.f32 0.0078125, %v151_v24  ;;  %v157_v26 = vmul.f32 %v155_v23, %v155_v23 }
 0x176   :  { %v156_v27 = vsub.f32 %v147_v20, %v154_v25  ;;  %159 = vadd.xlane.f32.xlu1 %v157_v26 }
 0x178   :  { %v158_v28 = vmul.f32 %v156_v27, %v156_v27 }
 0x17a   :  { %161 = vadd.xlane.f32.xlu1 %v158_v28 }
 0x1ff   :  { %v160_v29 = vpop.xlane.xlu1 %159 }
 0x200   :  { %v163_v30 = vmul.f32 0.0078125, %v160_v29 }
 0x202   :  { %v165_v31 = vadd.f32 1e-05, %v163_v30 }
 0x203   :  { %v162_v32 = vpop.xlane.xlu1 %161 }
 0x204   :  { %247 = vrsqrt.f32 %v165_v31  ;;  %v164_v33 = vmul.f32 0.0078125, %v162_v32 }
 0x206   :  { %v166_v34 = vadd.f32 1e-05, %v164_v33 }
 0x208   :  { %249 = vrsqrt.f32 %v166_v34 }
 0x211   :  { %v248_v35 = vpop.eup %247 }
 0x212   :  { %v169_v37 = vmul.f32 %v248_v35, %v155_v23 }
 0x214   :  { %v178_v39 = vmul.f32 %v205_v36, %v169_v37 }
 0x215   :  { %v250_v40 = vpop.eup %249 }
 0x216   :  { %v187_v41 = vadd.f32 %v206_v38, %v178_v39  ;;  %v170_v42 = vmul.f32 %v250_v40, %v156_v27 }
 0x218   :  { %189 = vst [vmem:[%s342_s6] sm:$0xff] %v187_v41  ;;  %v179_v43 = vmul.f32 %v205_v36, %v170_v42 }
 0x21a   :  { %v188_v44 = vadd.f32 %v206_v38, %v179_v43 }
 0x21c   :  { %190 = vst [vmem:[%s342_s6 + $0x8] sm:$0xff] %v188_v44 }

// kernel: bart_lm_forward.41
= control target key start
LH: loop header
LB: loop body
LE: loop exit
PB: predicated region body
PF: predicated region fallthrough
CT: control target
= control target key end

     0   :  { %v263_v1 = vmov 0   ;;  %v186_v20 = vlaneseq  ;;  %s347_s1 = inlined_call_operand.vmem [shape: bf16[128,256], index: 1, kind: input, shape index: {}]   ;;  %s348_s0 = inlined_call_operand.vmem [shape: f32[16,128], index: 0, kind: input, shape index: {}]   ;;  %s349_s2 = inlined_call_operand.vmem [shape: f32[1,256], index: 2, kind: input, shape index: {}]   ;;  %s350_s3 = inlined_call_operand.vmem [shape: bf16[16,256], index: 3, kind: output, shape index: {}]  }
   0x1   :  { %v239_v0 = vld [vmem:[%s347_s1 + $0x74] ss:$8 sps:$4 sm:$0xff]   ;;  %158 = vmatprep.mubr.bf16.mxu0 %v263_v1  ;;  %v241_v2 = vld [vmem:[%s347_s1 + $0x70] ss:$8 sps:$4 sm:$0xff]   ;;  %v242_v3 = vld [vmem:[%s347_s1 + $0x64] ss:$8 sps:$4 sm:$0xff]  }
   0x2   :  { %126 = vmatprep.subr.bf16.mxu0 %v239_v0  ;;  %v244_v4 = vld [vmem:[%s347_s1 + $0x60] ss:$8 sps:$4 sm:$0xff]   ;;  %v245_v5 = vld [vmem:[%s347_s1 + $0x54] ss:$8 sps:$4 sm:$0xff]   ;;  %v247_v6 = vld [vmem:[%s347_s1 + $0x50] ss:$8 sps:$4 sm:$0xff]  }
   0x3   :  { %127 = vmatpush1.bf16.msra.mxu0 %v241_v2  ;;  %v248_v7 = vld [vmem:[%s347_s1 + $0x44] ss:$8 sps:$4 sm:$0xff]   ;;  %v250_v8 = vld [vmem:[%s347_s1 + $0x40] ss:$8 sps:$4 sm:$0xff]   ;;  %v251_v9 = vld [vmem:[%s347_s1 + $0x34] ss:$8 sps:$4 sm:$0xff]  }
   0x4   :  { %128 = vmatprep.subr.bf16.mxu0 %v242_v3  ;;  %v253_v10 = vld [vmem:[%s347_s1 + $0x30] ss:$8 sps:$4 sm:$0xff]   ;;  %v254_v11 = vld [vmem:[%s347_s1 + $0x24] ss:$8 sps:$4 sm:$0xff]   ;;  %v256_v12 = vld [vmem:[%s347_s1 + $0x20] ss:$8 sps:$4 sm:$0xff]  }
   0x5   :  { %v257_v13 = vld [vmem:[%s347_s1 + $0x14] ss:$8 sps:$4 sm:$0xff]   ;;  %v259_v14 = vld [vmem:[%s347_s1 + $0x10] ss:$8 sps:$4 sm:$0xff]   ;;  %v260_v15 = vld [vmem:[%s347_s1 + $0x4] ss:$8 sps:$4 sm:$0xff]  }
   0x6   :  { %v262_v16 = vld [vmem:[%s347_s1] ss:$8 sps:$4 sm:$0xff]   ;;  %v187_v21 = vshrl.u32 %v186_v20, 7 }
   0x7   :  { %129 = vmatpush1.bf16.msra.mxu0 %v244_v4  ;;  %v27_v17 = vld [vmem:[%s348_s0] sm:$0xff]  ;;  %v28_v18 = vld [vmem:[%s348_s0 + $0x8] sm:$0xff] }
   0x8   :  { %130 = vmatprep.subr.bf16.mxu0 %v245_v5  ;;  %v29_v19 = vpack.c.bf16 %v28_v18, %v27_v17  ;;  %v188_v22 = vsub.s32 0, %v187_v21  ;;  %v192_v23 = vsub.s32 1, %v187_v21  ;;  %v184_v24 = vld [vmem:[%s349_s2] sm:$0x3] }
   0xa   :  { %v189_v25 = vrot.slane %v184_v24, %v188_v22  ;;  %v193_v26 = vrot.slane %v184_v24, %v192_v23 }
   0xb   :  { %131 = vmatpush1.bf16.msra.mxu0 %v247_v6 }
   0xc   :  { %132 = vmatprep.subr.bf16.mxu0 %v248_v7 }
   0xf   :  { %133 = vmatpush1.bf16.msra.mxu0 %v250_v8 }
  0x10   :  { %134 = vmatprep.subr.bf16.mxu0 %v251_v9 }
  0x13   :  { %135 = vmatpush1.bf16.msra.mxu0 %v253_v10 }
  0x14   :  { %136 = vmatprep.subr.bf16.mxu0 %v254_v11 }
  0x17   :  { %137 = vmatpush1.bf16.msra.mxu0 %v256_v12 }
  0x18   :  { %138 = vmatprep.subr.bf16.mxu0 %v257_v13 }
  0x1b   :  { %139 = vmatpush1.bf16.msra.mxu0 %v259_v14 }
  0x1c   :  { %140 = vmatprep.subr.bf16.mxu0 %v260_v15 }
  0x1f   :  { %141 = vmatpush1.bf16.msra.mxu0 %v262_v16 }
  0x22   :  { %159 = vmatmul.mubr.bf16.vlgmr.msra.gmra.mxu0 %v29_v19 }
  0xe2   :  { %v160_v27 = vpop.f32.mrf.mxu0 }
  0xe3   :  { %v196_v29 = vadd.f32 %v189_v25, %v160_v27 }
  0xe4   :  { %v162_v28 = vpop.f32.mrf.mxu0 }
  0xe5   :  { %v197_v30 = vadd.f32 %v193_v26, %v162_v28 }
  0xe6   :  { %v164_v31 = vpop.f32.mrf.mxu0 }
  0xe7   :  { %v236_v32 = vpack.c.bf16 %v197_v30, %v196_v29  ;;  %v198_v34 = vadd.f32 %v189_v25, %v164_v31 }
  0xe8   :  { %v166_v33 = vpop.f32.mrf.mxu0 }
  0xe9   :  { %212 = vst [vmem:[%s350_s3] sm:$0xff] %v236_v32  ;;  %v199_v35 = vadd.f32 %v193_v26, %v166_v33 }
  0xeb   :  { %v237_v36 = vpack.c.bf16 %v199_v35, %v198_v34 }
  0xed   :  { %213 = vst [vmem:[%s350_s3 + $0x8] sm:$0xff] %v237_v36 }

// kernel: bart_lm_forward.31
= control target key start
LH: loop header
LB: loop body
LE: loop exit
PB: predicated region body
PF: predicated region fallthrough
CT: control target
= control target key end

     0   :  { %v557_v1 = vmov 0   ;;  %v54_v36 = vlaneseq  ;;  %s726_s1 = inlined_call_operand.vmem [shape: bf16[128,256], index: 1, kind: input, shape index: {}]   ;;  %s727_s0 = inlined_call_operand.vmem [shape: f32[16,128], index: 0, kind: input, shape index: {}]   ;;  %s728_s3 = inlined_call_operand.vmem [shape: bf16[256,128], index: 3, kind: input, shape index: {}]   ;;  %s729_s2 = inlined_call_operand.vmem [shape: f32[1,256], index: 2, kind: input, shape index: {}]   ;;  %s730_s4 = inlined_call_operand.vmem [shape: f32[1,128], index: 4, kind: input, shape index: {}]   ;;  %s731_s5 = inlined_call_operand.vmem [shape: f32[1,128], index: 5, kind: input, shape index: {}]   ;;  %s732_s6 = inlined_call_operand.vmem [shape: f32[1,128], index: 6, kind: input, shape index: {}]   ;;  %s733_s7 = inlined_call_operand.vmem [shape: f32[16,128], index: 7, kind: output, shape index: {}]  }
   0x1   :  { %v505_v0 = vld [vmem:[%s726_s1 + $0x74] ss:$8 sps:$4 sm:$0xff]   ;;  %176 = vmatprep.mubr.bf16.mxu0 %v557_v1  ;;  %v507_v2 = vld [vmem:[%s726_s1 + $0x70] ss:$8 sps:$4 sm:$0xff]   ;;  %v508_v3 = vld [vmem:[%s726_s1 + $0x64] ss:$8 sps:$4 sm:$0xff]  }
   0x2   :  { %144 = vmatprep.subr.bf16.mxu0 %v505_v0  ;;  %v510_v4 = vld [vmem:[%s726_s1 + $0x60] ss:$8 sps:$4 sm:$0xff]   ;;  %v511_v5 = vld [vmem:[%s726_s1 + $0x54] ss:$8 sps:$4 sm:$0xff]   ;;  %v513_v6 = vld [vmem:[%s726_s1 + $0x50] ss:$8 sps:$4 sm:$0xff]  }
   0x3   :  { %145 = vmatpush1.bf16.msra.mxu0 %v507_v2  ;;  %v514_v7 = vld [vmem:[%s726_s1 + $0x44] ss:$8 sps:$4 sm:$0xff]   ;;  %v516_v8 = vld [vmem:[%s726_s1 + $0x40] ss:$8 sps:$4 sm:$0xff]   ;;  %v517_v9 = vld [vmem:[%s726_s1 + $0x34] ss:$8 sps:$4 sm:$0xff]  }
   0x4   :  { %146 = vmatprep.subr.bf16.mxu0 %v508_v3  ;;  %v519_v10 = vld [vmem:[%s726_s1 + $0x30] ss:$8 sps:$4 sm:$0xff]   ;;  %v520_v11 = vld [vmem:[%s726_s1 + $0x24] ss:$8 sps:$4 sm:$0xff]   ;;  %v522_v12 = vld [vmem:[%s726_s1 + $0x20] ss:$8 sps:$4 sm:$0xff]  }
   0x5   :  { %v523_v13 = vld [vmem:[%s726_s1 + $0x14] ss:$8 sps:$4 sm:$0xff]   ;;  %v525_v14 = vld [vmem:[%s726_s1 + $0x10] ss:$8 sps:$4 sm:$0xff]   ;;  %v526_v15 = vld [vmem:[%s726_s1 + $0x4] ss:$8 sps:$4 sm:$0xff]  }
   0x6   :  { %v528_v16 = vld [vmem:[%s726_s1] ss:$8 sps:$4 sm:$0xff]   ;;  %v529_v20 = vld [vmem:[%s728_s3 + $0x78] sm:$0xff]   ;;  %v531_v22 = vld [vmem:[%s728_s3 + $0x70] sm:$0xff]   ;;  %v55_v37 = vshrl.u32 %v54_v36, 7 }
   0x7   :  { %147 = vmatpush1.bf16.msra.mxu0 %v510_v4  ;;  %v649_v17 = vld [vmem:[%s727_s0] sm:$0xff]  ;;  %v654_v18 = vld [vmem:[%s727_s0 + $0x8] sm:$0xff]  ;;  %v530_v21 = vld [vmem:[%s728_s3 + $0x38] sm:$0xff]   ;;  %482 = vmatprep.subr.bf16.mxu1 %v529_v20 }
   0x8   :  { %148 = vmatprep.subr.bf16.mxu0 %v511_v5  ;;  %v35_v19 = vpack.c.bf16 %v654_v18, %v649_v17  ;;  %483 = vmatpush3.bf16.msra.mxu1 %v530_v21  ;;  %v532_v23 = vld [vmem:[%s728_s3 + $0x30] sm:$0xff]   ;;  %v533_v24 = vld [vmem:[%s728_s3 + $0x68] sm:$0xff]   ;;  %v535_v26 = vld [vmem:[%s728_s3 + $0x60] sm:$0xff]   ;;  %v56_v38 = vsub.s32 0, %v55_v37  ;;  %v60_v40 = vsub.s32 1, %v55_v37 }
   0x9   :  { %484 = vmatprep.subr.bf16.mxu1 %v531_v22  ;;  %v534_v25 = vld [vmem:[%s728_s3 + $0x28] sm:$0xff]   ;;  %v536_v27 = vld [vmem:[%s728_s3 + $0x20] sm:$0xff]   ;;  %v537_v28 = vld [vmem:[%s728_s3 + $0x58] sm:$0xff]  }
   0xa   :  { %v538_v29 = vld [vmem:[%s728_s3 + $0x18] sm:$0xff]   ;;  %v539_v30 = vld [vmem:[%s728_s3 + $0x50] sm:$0xff]   ;;  %v541_v32 = vld [vmem:[%s728_s3 + $0x48] sm:$0xff]  }
   0xb   :  { %149 = vmatpush1.bf16.msra.mxu0 %v513_v6  ;;  %v540_v31 = vld [vmem:[%s728_s3 + $0x10] sm:$0xff]   ;;  %v542_v33 = vld [vmem:[%s728_s3 + $0x8] sm:$0xff]   ;;  %v543_v34 = vld [vmem:[%s728_s3 + $0x40] sm:$0xff]  }
   0xc   :  { %150 = vmatprep.subr.bf16.mxu0 %v514_v7  ;;  %485 = vmatpush3.bf16.msra.mxu1 %v532_v23  ;;  %v544_v35 = vld [vmem:[%s728_s3] sm:$0xff]  }
   0xd   :  { %486 = vmatprep.subr.bf16.mxu1 %v533_v24  ;;  %v52_v39 = vld [vmem:[%s729_s2] sm:$0x3] }
   0xe   :  { %v57_v41 = vrot.slane %v52_v39, %v56_v38  ;;  %v61_v42 = vrot.slane %v52_v39, %v60_v40  ;;  %v481_v37 = vld [vmem:[%s732_s6] ss:$0 sm:$0xff] }
   0xf   :  { %151 = vmatpush1.bf16.msra.mxu0 %v516_v8 }
  0x10   :  { %152 = vmatprep.subr.bf16.mxu0 %v517_v9  ;;  %487 = vmatpush3.bf16.msra.mxu1 %v534_v25 }
  0x11   :  { %488 = vmatprep.subr.bf16.mxu1 %v535_v26 }
  0x13   :  { %153 = vmatpush1.bf16.msra.mxu0 %v519_v10 }
  0x14   :  { %154 = vmatprep.subr.bf16.mxu0 %v520_v11  ;;  %489 = vmatpush3.bf16.msra.mxu1 %v536_v27  ;;  %v479_v11 = vld [vmem:[%s730_s4] ss:$0 sm:$0xff] }
  0x15   :  { %490 = vmatprep.subr.bf16.mxu1 %v537_v28 }
  0x17   :  { %155 = vmatpush1.bf16.msra.mxu0 %v522_v12 }
  0x18   :  { %156 = vmatprep.subr.bf16.mxu0 %v523_v13  ;;  %491 = vmatpush3.bf16.msra.mxu1 %v538_v29 }
  0x19   :  { %492 = vmatprep.subr.bf16.mxu1 %v539_v30 }
  0x1b   :  { %157 = vmatpush1.bf16.msra.mxu0 %v525_v14 }
  0x1c   :  { %158 = vmatprep.subr.bf16.mxu0 %v526_v15  ;;  %493 = vmatpush3.bf16.msra.mxu1 %v540_v31 }
  0x1d   :  { %494 = vmatprep.subr.bf16.mxu1 %v541_v32 }
  0x1f   :  { %159 = vmatpush1.bf16.msra.mxu0 %v528_v16 }
  0x20   :  { %495 = vmatpush3.bf16.msra.mxu1 %v542_v33 }
  0x21   :  { %496 = vmatprep.subr.bf16.mxu1 %v543_v34 }
  0x22   :  { %177 = vmatmul.mubr.bf16.vlgmr.msra.gmra.mxu0 %v35_v19 }
  0x24   :  { %497 = vmatpush3.bf16.msra.mxu1 %v544_v35  ;;  %v480_v35 = vld [vmem:[%s731_s5] ss:$0 sm:$0xff] }
  0xe2   :  { %v178_v43 = vpop.f32.mrf.mxu0 }
  0xe3   :  { %v179_v44 = vadd.f32 %v178_v43, %v57_v41 }
  0xe4   :  { %v180_v45 = vpop.f32.mrf.mxu0 }
  0xe5   :  { %v181_v46 = vadd.f32 %v180_v45, %v61_v42  ;;  %v191_v47 = vmul.f32 0.70710677, %v179_v44  ;;  %v187_v2 = vmul.f32 0.5, %v179_v44 }
  0xe6   :  { %v182_v48 = vpop.f32.mrf.mxu0 }
  0xe7   :  { %v192_v49 = vmul.f32 0.70710677, %v181_v46  ;;  %v183_v50 = vadd.f32 %v182_v48, %v57_v41  ;;  %v188_v63 = vmul.f32 0.5, %v181_v46 }
  0xe8   :  { %v184_v51 = vpop.f32.mrf.mxu0 }
  0xe9   :  { %545 = verf.f32 %v192_v49  ;;  %v193_v52 = vmul.f32 0.70710677, %v183_v50  ;;  %v185_v53 = vadd.f32 %v184_v51, %v61_v42  ;;  %v189_v62 = vmul.f32 0.5, %v183_v50 }
  0xea   :  { %547 = verf.f32 %v191_v47 }
  0xeb   :  { %549 = verf.f32 %v193_v52  ;;  %v194_v54 = vmul.f32 0.70710677, %v185_v53  ;;  %v190_v0 = vmul.f32 0.5, %v185_v53 }
  0xed   :  { %551 = verf.f32 %v194_v54 }
  0xf6   :  { %v546_v55 = vpop.eup %545 }
  0xf7   :  { %v548_v56 = vpop.eup %547  ;;  %v200_v59 = vadd.f32 1.0, %v546_v55 }
  0xf8   :  { %v550_v57 = vpop.eup %549  ;;  %v199_v61 = vadd.f32 1.0, %v548_v56 }
  0xf9   :  { %v201_v58 = vadd.f32 1.0, %v550_v57  ;;  %v204_v4 = vmul.f32 %v200_v59, %v188_v63 }
  0xfa   :  { %v552_v60 = vpop.eup %551  ;;  %v203_v6 = vmul.f32 %v199_v61, %v187_v2 }
  0xfb   :  { %v202_v1 = vadd.f32 1.0, %v552_v60  ;;  %v205_v3 = vmul.f32 %v201_v58, %v189_v62 }
  0xfd   :  { %v206_v5 = vmul.f32 %v202_v1, %v190_v0  ;;  %v209_v8 = vpack.c.bf16 %v205_v3, %v203_v6 }
  0xff   :  { %v210_v7 = vpack.c.bf16 %v206_v5, %v204_v4 }
 0x101   :  { %371 = vmatprep.mubr.bf16.mxu1 %v210_v7 }
 0x102   :  { %372 = vmatmul.mubr.bf16.vlgmr.msra.gmra.mxu1 %v209_v8 }
 0x1c2   :  { %v498_v9 = vpop.f32.mrf.mxu1 }
 0x1c4   :  { %v499_v10 = vpop.f32.mrf.mxu1 }
 0x1c5   :  { %v500_v12 = vadd.f32 %v499_v10, %v498_v9 }
 0x1c6   :  { %v501_v13 = vpop.f32.mrf.mxu1 }
 0x1c7   :  { %v396_v14 = vadd.f32 %v500_v12, %v479_v11 }
 0x1c8   :  { %v502_v15 = vpop.f32.mrf.mxu1 }
 0x1c9   :  { %v503_v16 = vadd.f32 %v502_v15, %v501_v13  ;;  %v398_v19 = vadd.f32 %v396_v14, %v649_v17 }
 0x1cb   :  { %v397_v20 = vadd.f32 %v503_v16, %v479_v11  ;;  %400 = vadd.xlane.f32.xlu0 %v398_v19 }
 0x1cd   :  { %v399_v21 = vadd.f32 %v397_v20, %v654_v18 }
 0x1cf   :  { %402 = vadd.xlane.f32.xlu0 %v399_v21 }
 0x254   :  { %v401_v22 = vpop.xlane.xlu0 %400 }
 0x255   :  { %v405_v23 = vmul.f32 0.0078125, %v401_v22 }
 0x257   :  { %v407_v24 = vsub.f32 %v398_v19, %v405_v23 }
 0x258   :  { %v403_v25 = vpop.xlane.xlu0 %402 }
 0x259   :  { %v406_v26 = vmul.f32 0.0078125, %v403_v25  ;;  %v409_v27 = vmul.f32 %v407_v24, %v407_v24 }
 0x25b   :  { %v408_v28 = vsub.f32 %v399_v21, %v406_v26  ;;  %411 = vadd.xlane.f32.xlu1 %v409_v27 }
 0x25d   :  { %v410_v29 = vmul.f32 %v408_v28, %v408_v28 }
 0x25f   :  { %413 = vadd.xlane.f32.xlu1 %v410_v29 }
 0x2e4   :  { %v412_v30 = vpop.xlane.xlu1 %411 }
 0x2e5   :  { %v415_v31 = vmul.f32 0.0078125, %v412_v30 }
 0x2e7   :  { %v417_v32 = vadd.f32 1e-05, %v415_v31 }
 0x2e8   :  { %v414_v33 = vpop.xlane.xlu1 %413 }
 0x2e9   :  { %553 = vrsqrt.f32 %v417_v32  ;;  %v416_v17 = vmul.f32 0.0078125, %v414_v33 }
 0x2eb   :  { %v418_v34 = vadd.f32 1e-05, %v416_v17 }
 0x2ed   :  { %555 = vrsqrt.f32 %v418_v34 }
 0x2f6   :  { %v554_v18 = vpop.eup %553 }
 0x2f7   :  { %v421_v36 = vmul.f32 %v554_v18, %v407_v24 }
 0x2f9   :  { %v430_v38 = vmul.f32 %v480_v35, %v421_v36 }
 0x2fa   :  { %v556_v39 = vpop.eup %555 }
 0x2fb   :  { %v439_v40 = vadd.f32 %v481_v37, %v430_v38  ;;  %v422_v41 = vmul.f32 %v556_v39, %v408_v28 }
 0x2fd   :  { %441 = vst [vmem:[%s733_s7] sm:$0xff] %v439_v40  ;;  %v431_v42 = vmul.f32 %v480_v35, %v422_v41 }
 0x2ff   :  { %v440_v43 = vadd.f32 %v481_v37, %v431_v42 }
 0x301   :  { %442 = vst [vmem:[%s733_s7 + $0x8] sm:$0xff] %v440_v43 }

// kernel: bart_lm_forward.53
= control target key start
LH: loop header
LB: loop body
LE: loop exit
PB: predicated region body
PF: predicated region fallthrough
CT: control target
= control target key end

     0   :  { %v287_v2 = vmov 0   ;;  %s371_s0 = inlined_call_operand.vmem [shape: f32[16,128], index: 0, kind: input, shape index: {}]   ;;  %s372_s1 = inlined_call_operand.vmem [shape: bf16[128,256], index: 1, kind: input, shape index: {}]   ;;  %s373_s2 = inlined_call_operand.vmem [shape: f32[1,256], index: 2, kind: input, shape index: {}]   ;;  %s374_s3 = inlined_call_operand.hbm [shape: f32[16,256], index: 3, kind: output, shape index: {}]  }
   0x1   :  { %v241_v0 = vld [vmem:[%s372_s1 + $0x74] ss:$8 sps:$4 sm:$0xff]   ;;  %v243_v1 = vld [vmem:[%s372_s1 + $0x70] ss:$8 sps:$4 sm:$0xff]   ;;  %159 = vmatprep.mubr.bf16.mxu0 %v287_v2  ;;  %v244_v3 = vld [vmem:[%s372_s1 + $0x64] ss:$8 sps:$4 sm:$0xff]  }
   0x2   :  { %127 = vmatprep.subr.bf16.mxu0 %v241_v0  ;;  %v246_v4 = vld [vmem:[%s372_s1 + $0x60] ss:$8 sps:$4 sm:$0xff]   ;;  %v247_v5 = vld [vmem:[%s372_s1 + $0x54] ss:$8 sps:$4 sm:$0xff]   ;;  %v249_v6 = vld [vmem:[%s372_s1 + $0x50] ss:$8 sps:$4 sm:$0xff]  }
   0x3   :  { %128 = vmatpush1.bf16.msra.mxu0 %v243_v1  ;;  %v250_v7 = vld [vmem:[%s372_s1 + $0x44] ss:$8 sps:$4 sm:$0xff]   ;;  %v252_v8 = vld [vmem:[%s372_s1 + $0x40] ss:$8 sps:$4 sm:$0xff]  }
   0x4   :  { %129 = vmatprep.subr.bf16.mxu0 %v244_v3 }
   0x7   :  { %130 = vmatpush1.bf16.msra.mxu0 %v246_v4 }
   0x8   :  { %131 = vmatprep.subr.bf16.mxu0 %v247_v5 }
   0xb   :  { %132 = vmatpush1.bf16.msra.mxu0 %v249_v6 }
   0xc   :  { %8 = vsyncpa [#allocation4], 0  ;;  %133 = vmatprep.subr.bf16.mxu0 %v250_v7  ;;  %v253_v9 = vld [vmem:[%s372_s1 + $0x34] ss:$8 sps:$4 sm:$0xff]   ;;  %v255_v10 = vld [vmem:[%s372_s1 + $0x30] ss:$8 sps:$4 sm:$0xff]   ;;  %v187_v20 = vlaneseq }
   0xd   :  { %v256_v11 = vld [vmem:[%s372_s1 + $0x24] ss:$8 sps:$4 sm:$0xff]   ;;  %v258_v12 = vld [vmem:[%s372_s1 + $0x20] ss:$8 sps:$4 sm:$0xff]   ;;  %v259_v13 = vld [vmem:[%s372_s1 + $0x14] ss:$8 sps:$4 sm:$0xff]  }
   0xe   :  { %v261_v14 = vld [vmem:[%s372_s1 + $0x10] ss:$8 sps:$4 sm:$0xff]   ;;  %v262_v15 = vld [vmem:[%s372_s1 + $0x4] ss:$8 sps:$4 sm:$0xff]   ;;  %v264_v16 = vld [vmem:[%s372_s1] ss:$8 sps:$4 sm:$0xff]  }
   0xf   :  { %134 = vmatpush1.bf16.msra.mxu0 %v252_v8  ;;  %v28_v17 = vld [vmem:[%s371_s0] sm:$0xff]  ;;  %v29_v18 = vld [vmem:[%s371_s0 + $0x8] sm:$0xff]  ;;  %v188_v21 = vshrl.u32 %v187_v20, 7  ;;  %s288_s0 = smov [#allocation3]  }
  0x10   :  { %135 = vmatprep.subr.bf16.mxu0 %v253_v9  ;;  %v30_v19 = vpack.c.bf16 %v29_v18, %v28_v17  ;;  %v185_v23 = vld [vmem:[%s373_s2] sm:$0x3]  ;;  %s210_s1 = sshll.u32 %s288_s0, 4  ;;  %s211_s1 = int_to_ptr.vmem [resolvable:$true] %s210_s1 }
  0x11   :  { %v189_v22 = vsub.s32 0, %v188_v21  ;;  %v193_v24 = vsub.s32 1, %v188_v21  ;;  %s265_s23 = scalar_lea.vmem %s211_s1, 512  ;;  %p270_p1 = scmp.lt.s32.totalorder %s211_s1, %s211_s1 }
  0x12   :  { %p266_p0 = scmp.ne.s32.totalorder %s211_s1, %s265_s23  ;;  %p271_p2 = scmp.lt.s32.totalorder %s265_s23, %s265_s23 }
  0x13   :  { %136 = vmatpush1.bf16.msra.mxu0 %v255_v10  ;;  %v190_v25 = vrot.slane %v185_v23, %v189_v22  ;;  %v194_v26 = vrot.slane %v185_v23, %v193_v24 }
  0x14   :  { %137 = vmatprep.subr.bf16.mxu0 %v256_v11  ;;  %p272_p3 = por %p271_p2, %p270_p1 }
  0x16   :  { %p273_p4 = pnand %p272_p3, %p266_p0 }
  0x17   :  { %138 = vmatpush1.bf16.msra.mxu0 %v258_v12 }
  0x18   :  { %139 = vmatprep.subr.bf16.mxu0 %v259_v13 }
  0x1b   :  { %140 = vmatpush1.bf16.msra.mxu0 %v261_v14 }
  0x1c   :  { %141 = vmatprep.subr.bf16.mxu0 %v262_v15 }
  0x1f   :  { %142 = vmatpush1.bf16.msra.mxu0 %v264_v16 }
  0x22   :  { %160 = vmatmul.mubr.bf16.vlgmr.msra.gmra.mxu0 %v30_v19 }
  0xe2   :  { %v161_v27 = vpop.f32.mrf.mxu0 }
  0xe3   :  { %v197_v28 = vadd.f32 %v190_v25, %v161_v27 }
  0xe4   :  { %v163_v29 = vpop.f32.mrf.mxu0 }
  0xe5   :  { %201 = vst [vmem:[#allocation3] sm:$0xff] %v197_v28  ;;  %v198_v30 = vadd.f32 %v194_v26, %v163_v29 }
  0xe6   :  { %v165_v31 = vpop.f32.mrf.mxu0 }
  0xe7   :  { %202 = vst [vmem:[#allocation3 + $0x8] sm:$0xff] %v198_v30  ;;  %v199_v32 = vadd.f32 %v190_v25, %v165_v31 }
  0xe8   :  { %v167_v33 = vpop.f32.mrf.mxu0 }
  0xe9   :  { %203 = vst [vmem:[#allocation3 + $0x10] sm:$0xff] %v199_v32  ;;  %v200_v34 = vadd.f32 %v194_v26, %v167_v33 }
  0xeb   :  { %204 = vst [vmem:[#allocation3 + $0x18] sm:$0xff] %v200_v34 }
  0xec   :  { %276 = shalt.err (!%p273_p4)
}
  0xed   :  { %s289_s2 = smov 256   ;;  %s290_s24 = smov 16  }
  0xee   :  { %216 = dma.vmem_to_hbm [thread:$0]  %s211_s1, 512, %s374_s3, [#allocation4], %s289_s2, %s289_s2, %s290_s24  }
  0xef   :  { %285 = dma.done.wait [#allocation4], 512  }
  0xf0   :  { %286 = vsyncadd [#allocation4], 4294966784 }
  0xf1   :  { %220 = vsyncpa [#allocation4], 1 }

// kernel: bart_lm_forward.29
= control target key start
LH: loop header
LB: loop body
LE: loop exit
PB: predicated region body
PF: predicated region fallthrough
CT: control target
= control target key end

     0   :  { %s1040_s15 = smov 0   ;;  %s1042_s16 = smov 0   ;;  %s1140_s0 = inlined_call_operand.vmem [shape: bf16[2,4,8,32], index: 0, kind: input, shape index: {}]   ;;  %s1141_s1 = inlined_call_operand.vmem [shape: bf16[2,4,8,32], index: 1, kind: input, shape index: {}]   ;;  %s1142_s2 = inlined_call_operand.vmem [shape: bf16[2,4,8,32], index: 2, kind: input, shape index: {}]   ;;  %s1143_s3 = inlined_call_operand.vmem [shape: f32[2,1,8], index: 3, kind: input, shape index: {}]   ;;  %s1144_s4 = inlined_call_operand.vmem [shape: bf16[2,4,8,32], index: 4, kind: output, shape index: {}]  }
   0x1   :  { %s1044_s17 = smov 0  }
   0x2 LB: > { %s26_s18 = sadd.s32 1, %s1007_s16  ;;  %p859_p0 = scmp.ge.s32.totalorder %s1011_s17, 1  ;;  %s1011_s17 = sphi %s1044_s17, %s14_s17   ;;  %s1007_s16 = sphi %s1042_s16, %s1146_s16   ;;  %s1003_s15 = sphi %s1040_s15, %s1145_s15  }
   0x3   : > { %p28_p1 = scmp.ge.s32.totalorder %s26_s18, 2  ;;  %p209_p2 = scmp.lt.s32.totalorder %s1011_s17, 3 }
   0x5   : > { %s1148_s18 = smov (%p28_p1, %s26_s18), 0  ;;  %p210_p3 = pnand %p859_p0, %p209_p2 }
   0x6   : > { %p254_p4 = scmp.lt.s32.totalorder (!%p210_p3), %s1003_s15, 1 }
   0x7   : > { %213 = sbr.rel (%p210_p3) target bundleno = 746 (0x2ea), region = 36 }
   0xc   : > { %v1013_v0 = vmov 0.0   ;;  %s1150_s15 = smov (!%p254_p4, %s1003_s15), 1  ;;  %vm1014_vm0 = vmmov 0   ;;  %vm296_vm1 = vcmask 261120   ;;  %vm496_vm2 = vcmask 64512  }
   0xd   : > { %899 = vmatprep.subr.bf16.mxu0 %v1013_v0  ;;  %905 = vmatprep.subr.bf16.mxu1 %v1013_v0  ;;  %s1067_s19 = sshll.u32 %s1150_s15, 4  ;;  %s274_s28 = scalar_lea.vmem %s1143_s3, %s1150_s15  ;;  %vm548_vm3 = vcmask 1043456   ;;  %vm734_vm4 = vcmask 257024  }
   0xe   : > { %901 = vmatprep.mubr.msk.bf16.mxu0 %vm1014_vm0, %v1013_v0  ;;  %907 = vmatprep.mubr.msk.bf16.mxu1 %vm1014_vm0, %v1013_v0  ;;  %s266_s22 = scalar_lea.vmem %s1141_s1, %s1067_s19  ;;  %s261_s25 = scalar_lea.vmem %s1140_s0, %s1067_s19  ;;  %v872_v15 = vld [vmem:[%s274_s28] ss:$0 sm:$0xff] }
   0xf   : > { %v288_v1 = vld [vmem:[%s266_s22] sm:$0xf]  ;;  %v289_v2 = vld [vmem:[%s266_s22 + $0x4] sm:$0xf]  ;;  %v290_v5 = vld [vmem:[%s266_s22 + $0x8] sm:$0xf]  ;;  %s271_s5 = scalar_lea.vmem %s1142_s2, %s1067_s19  ;;  %s282_s8 = scalar_lea.vmem %s1144_s4, %s1067_s19 }
  0x10   : > { %v301_v3 = vsel %vm296_vm1, %v288_v1, 0  ;;  %v347_v4 = vsel %vm296_vm1, %v289_v2, 0  ;;  %v291_v6 = vld [vmem:[%s266_s22 + $0xc] sm:$0xf]  ;;  %v284_v7 = vld [vmem:[%s261_s25] sm:$0xf] }
  0x11   : > { %900 = vmatpush3.bf16.xpose.msra.mxu0 %v301_v3  ;;  %906 = vmatpush3.bf16.xpose.msra.mxu1 %v347_v4  ;;  %v285_v8 = vld [vmem:[%s261_s25 + $0x4] sm:$0xf]  ;;  %v393_v9 = vsel %vm296_vm1, %v290_v5, 0  ;;  %v439_v10 = vsel %vm296_vm1, %v291_v6, 0  ;;  %v286_v11 = vld [vmem:[%s261_s25 + $0x8] sm:$0xf] }
  0x12   : > { %911 = vmatprep.subr.bf16.mxu0 %v1013_v0  ;;  %917 = vmatprep.subr.bf16.mxu1 %v1013_v0  ;;  %v287_v12 = vld [vmem:[%s261_s25 + $0xc] sm:$0xf]  ;;  %v292_v62 = vld [vmem:[%s271_s5] sm:$0xf]  ;;  %v293_v63 = vld [vmem:[%s271_s5 + $0x4] sm:$0xf] }
  0x13   : > { %v550_v1 = vsel %vm548_vm3, %v292_v62, 0  ;;  %v596_v2 = vsel %vm548_vm3, %v293_v63, 0  ;;  %v294_v3 = vld [vmem:[%s271_s5 + $0x8] sm:$0xf]  ;;  %v295_v5 = vld [vmem:[%s271_s5 + $0xc] sm:$0xf] }
  0x14   : > { %v642_v4 = vsel %vm548_vm3, %v294_v3, 0  ;;  %v688_v6 = vsel %vm548_vm3, %v295_v5, 0 }
  0x18   : > { %902 = vmatmul.mubr.msk.bf16.vlgmr.msra.gmra.mxu0 %vm296_vm1, %v284_v7  ;;  %908 = vmatmul.mubr.msk.bf16.vlgmr.msra.gmra.mxu1 %vm296_vm1, %v285_v8 }
  0x19   : > { %912 = vmatpush3.bf16.xpose.msra.mxu0 %v393_v9  ;;  %918 = vmatpush3.bf16.xpose.msra.mxu1 %v439_v10 }
  0x1a   : > { %913 = vmatprep.mubr.msk.bf16.mxu0 %vm1014_vm0, %v1013_v0  ;;  %919 = vmatprep.mubr.msk.bf16.mxu1 %vm1014_vm0, %v1013_v0 }
  0x1b   : > { %923 = vmatprep.subr.bf16.mxu0 %v1013_v0  ;;  %929 = vmatprep.subr.bf16.mxu1 %v1013_v0 }
  0x20   : > { %914 = vmatmul.mubr.msk.bf16.vlgmr.msra.gmra.mxu0 %vm296_vm1, %v286_v11  ;;  %920 = vmatmul.mubr.msk.bf16.vlgmr.msra.gmra.mxu1 %vm296_vm1, %v287_v12 }
  0x21   : > { %925 = vmatprep.mubr.msk.bf16.mxu0 %vm1014_vm0, %v1013_v0  ;;  %931 = vmatprep.mubr.msk.bf16.mxu1 %vm1014_vm0, %v1013_v0 }
  0x22   : > { %924 = vmatpush3.bf16.msra.mxu0 %v550_v1  ;;  %930 = vmatpush3.bf16.msra.mxu1 %v596_v2 }
  0x23   : > { %935 = vmatprep.subr.bf16.mxu0 %v1013_v0  ;;  %941 = vmatprep.subr.bf16.mxu1 %v1013_v0 }
  0xd8   : > { %v337_v13 = vpop.f32.mrf.mxu0  ;;  %v383_v14 = vpop.f32.mrf.mxu1 }
  0xd9   : > { %v481_v16 = vmul.f32 0.17677669, %v337_v13  ;;  %v482_v17 = vmul.f32 0.17677669, %v383_v14 }
  0xda   : > { %v903_v18 = vpop.f32.mrf.mxu0  ;;  %v909_v19 = vpop.f32.mrf.mxu1 }
  0xdb   : > { %v492_v20 = vadd.f32 %v872_v15, %v481_v16  ;;  %v493_v21 = vadd.f32 %v872_v15, %v482_v17 }
  0xdc   : > { %v340_v22 = vpop.f32.mrf.mxu0  ;;  %v386_v23 = vpop.f32.mrf.mxu1 }
  0xdd   : > { %v497_v24 = vsel %vm496_vm2, %v492_v20, -inf  ;;  %v500_v27 = vsel %vm496_vm2, %v493_v21, -inf }
  0xde   : > { %v910_v25 = vpop.f32.mrf.mxu1  ;;  %498 = vmax.xlane.f32.xlu0 %v497_v24  ;;  %v904_v26 = vpop.f32.mrf.mxu0 }
  0xe0   : > { %v429_v28 = vpop.f32.mrf.mxu0  ;;  %v475_v29 = vpop.f32.mrf.mxu1 }
  0xe1   : > { %v483_v30 = vmul.f32 0.17677669, %v429_v28  ;;  %v484_v31 = vmul.f32 0.17677669, %v475_v29 }
  0xe2   : > { %v921_v32 = vpop.f32.mrf.mxu1  ;;  %501 = vmax.xlane.f32.xlu0 %v500_v27  ;;  %v915_v33 = vpop.f32.mrf.mxu0 }
  0xe3   : > { %v494_v34 = vadd.f32 %v872_v15, %v483_v30  ;;  %v495_v35 = vadd.f32 %v872_v15, %v484_v31 }
  0xe4   : > { %v432_v36 = vpop.f32.mrf.mxu0  ;;  %v478_v37 = vpop.f32.mrf.mxu1 }
  0xe5   : > { %v503_v38 = vsel %vm496_vm2, %v494_v34, -inf  ;;  %v506_v41 = vsel %vm496_vm2, %v495_v35, -inf }
  0xe6   : > { %v922_v39 = vpop.f32.mrf.mxu1  ;;  %504 = vmax.xlane.f32.xlu1 %v503_v38  ;;  %v916_v40 = vpop.f32.mrf.mxu0 }
  0xea   : > { %507 = vmax.xlane.f32.xlu1 %v506_v41 }
 0x167   : > { %v499_v42 = vpop.xlane.xlu0 %498 }
 0x168   : > { %v509_v43 = vsub.f32 %v492_v20, %v499_v42 }
 0x16a   : > { %v513_v44 = vmul.f32 1.442695, %v509_v43 }
 0x16b   : > { %v502_v45 = vpop.xlane.xlu0 %501 }
 0x16c   : > { %973 = vpow2.f32 %v513_v44  ;;  %v510_v46 = vsub.f32 %v493_v21, %v502_v45 }
 0x16e   : > { %v515_v47 = vmul.f32 1.442695, %v510_v46 }
 0x16f   : > { %v505_v48 = vpop.xlane.xlu1 %504 }
 0x170   : > { %975 = vpow2.f32 %v515_v47  ;;  %v511_v49 = vsub.f32 %v494_v34, %v505_v48 }
 0x172   : > { %v517_v50 = vmul.f32 1.442695, %v511_v49 }
 0x173   : > { %v508_v51 = vpop.xlane.xlu1 %507 }
 0x174   : > { %977 = vpow2.f32 %v517_v50  ;;  %v512_v52 = vsub.f32 %v495_v35, %v508_v51 }
 0x176   : > { %v519_v53 = vmul.f32 1.442695, %v512_v52 }
 0x178   : > { %979 = vpow2.f32 %v519_v53 }
 0x179   : > { %v974_v54 = vpop.eup %973 }
 0x17a   : > { %v521_v55 = vsel %vm496_vm2, %v974_v54, 0.0 }
 0x17b   : > { %522 = vadd.xlane.f32.xlu0 %v521_v55 }
 0x17d   : > { %v976_v56 = vpop.eup %975 }
 0x17e   : > { %v524_v57 = vsel %vm496_vm2, %v976_v56, 0.0 }
 0x17f   : > { %525 = vadd.xlane.f32.xlu1 %v524_v57 }
 0x181   : > { %v978_v58 = vpop.eup %977 }
 0x182   : > { %v527_v59 = vsel %vm496_vm2, %v978_v58, 0.0 }
 0x183   : > { %528 = vadd.xlane.f32.xlu0 %v527_v59 }
 0x185   : > { %v980_v60 = vpop.eup %979 }
 0x186   : > { %v530_v61 = vsel %vm496_vm2, %v980_v60, 0.0 }
 0x187   : > { %531 = vadd.xlane.f32.xlu1 %v530_v61 }
 0x204   : > { %v523_v7 = vpop.xlane.xlu0 %522 }
 0x205   : > { %981 = vrcp.f32 %v523_v7 }
 0x208   : > { %v526_v8 = vpop.xlane.xlu1 %525 }
 0x209   : > { %983 = vrcp.f32 %v526_v8 }
 0x20c   : > { %v529_v9 = vpop.xlane.xlu0 %528 }
 0x20d   : > { %985 = vrcp.f32 %v529_v9 }
 0x210   : > { %v532_v10 = vpop.xlane.xlu1 %531 }
 0x211   : > { %987 = vrcp.f32 %v532_v10 }
 0x212   : > { %v982_v11 = vpop.eup %981 }
 0x213   : > { %v537_v12 = vmul.f32 %v982_v11, %v974_v54 }
 0x215   : > { %v541_v13 = vpack.c.bf16 %v537_v12, %v537_v12 }
 0x216   : > { %v984_v14 = vpop.eup %983 }
 0x217   : > { %926 = vmatmul.mubr.msk.bf16.vlgmr.msra.gmra.mxu0 %vm496_vm2, %v541_v13  ;;  %v538_v15 = vmul.f32 %v984_v14, %v976_v56 }
 0x218   : > { %936 = vmatpush3.bf16.msra.mxu0 %v642_v4  ;;  %937 = vmatprep.mubr.msk.bf16.mxu0 %vm1014_vm0, %v1013_v0 }
 0x219   : > { %v542_v16 = vpack.c.bf16 %v538_v15, %v538_v15 }
 0x21a   : > { %v986_v17 = vpop.eup %985 }
 0x21b   : > { %932 = vmatmul.mubr.msk.bf16.vlgmr.msra.gmra.mxu1 %vm496_vm2, %v542_v16  ;;  %v539_v18 = vmul.f32 %v986_v17, %v978_v58 }
 0x21c   : > { %942 = vmatpush3.bf16.msra.mxu1 %v688_v6  ;;  %943 = vmatprep.mubr.msk.bf16.mxu1 %vm1014_vm0, %v1013_v0 }
 0x21d   : > { %v543_v19 = vpack.c.bf16 %v539_v18, %v539_v18 }
 0x21e   : > { %v988_v20 = vpop.eup %987 }
 0x21f   : > { %938 = vmatmul.mubr.msk.bf16.vlgmr.msra.gmra.mxu0 %vm496_vm2, %v543_v19  ;;  %v540_v21 = vmul.f32 %v988_v20, %v980_v60 }
 0x221   : > { %v544_v22 = vpack.c.bf16 %v540_v21, %v540_v21 }
 0x223   : > { %944 = vmatmul.mubr.msk.bf16.vlgmr.msra.gmra.mxu1 %vm496_vm2, %v544_v22 }
 0x2d7   : > { %v586_v23 = vpop.f32.mrf.mxu0 }
 0x2d8   : > { %v730_v24 = vpack.c.bf16 %v586_v23, %v586_v23 }
 0x2d9   : > { %v927_v25 = vpop.f32.mrf.mxu0 }
 0x2da   : > { %735 = vst.msk [vmem:[%s282_s8] sm:$0xf] %vm734_vm4, %v730_v24 }
 0x2db   : > { %v589_v26 = vpop.f32.mrf.mxu0  ;;  %v632_v0 = vpop.f32.mrf.mxu1 }
 0x2dc   : > { %v731_v27 = vpack.c.bf16 %v632_v0, %v632_v0 }
 0x2dd   : > { %v928_v28 = vpop.f32.mrf.mxu0  ;;  %v933_v29 = vpop.f32.mrf.mxu1 }
 0x2de   : > { %736 = vst.msk [vmem:[%s282_s8 + $0x4] sm:$0xf] %vm734_vm4, %v731_v27 }
 0x2df   : > { %v635_v30 = vpop.f32.mrf.mxu1  ;;  %v678_v31 = vpop.f32.mrf.mxu0 }
 0x2e0   : > { %v732_v32 = vpack.c.bf16 %v678_v31, %v678_v31 }
 0x2e1   : > { %v934_v33 = vpop.f32.mrf.mxu1  ;;  %v939_v34 = vpop.f32.mrf.mxu0 }
 0x2e2   : > { %737 = vst.msk [vmem:[%s282_s8 + $0x8] sm:$0xf] %vm734_vm4, %v732_v32 }
 0x2e3   : > { %v681_v35 = vpop.f32.mrf.mxu0  ;;  %v724_v36 = vpop.f32.mrf.mxu1 }
 0x2e4   : > { %v733_v37 = vpack.c.bf16 %v724_v36, %v724_v36 }
 0x2e5   : > { %v940_v38 = vpop.f32.mrf.mxu0  ;;  %v945_v39 = vpop.f32.mrf.mxu1 }
 0x2e6   : > { %738 = vst.msk [vmem:[%s282_s8 + $0xc] sm:$0xf] %vm734_vm4, %v733_v37 }
 0x2e7   : > { %v727_v40 = vpop.f32.mrf.mxu1 }
 0x2e9   : > { %v946_v41 = vpop.f32.mrf.mxu1 }
 0x2ea PF: > { %s14_s17 = sadd.s32 1, %s1011_s17   ;;  %s1145_s15 = smov %s1007_s16 }
 0x2eb   : > { %p11_p5 = scmp.ge.s32.totalorder %s14_s17, 4   ;;  %s1146_s16 = smov %s1148_s18 }
 0x2ed   :  { %13 = sbr.rel (!%p11_p5) target bundleno = 2 (0x2), region = 75 }

</bundles_post_ra>
